<compile_context>
chip_gen: v6e
topology: v6e:2x2x1
jax: 0.10.0
libtpu: 0.0.40
codegen_flags: <defaults>
</compile_context>

<pallas_src>
import functools

import jax
import jax.numpy as jnp
from jax import lax
from jax.experimental import pallas as pl
from jax.experimental.pallas import tpu as pltpu


# ---------------------------------------------------------------------------
# Helpers
# ---------------------------------------------------------------------------
def _round_up(x, m):
    return ((x + m - 1) // m) * m


def _time_loop(T, body, carry):
    # Short fixed T: static unroll (best LLO scheduling, no loop overhead).
    # Long T: fori_loop so live ranges / bundle count stay bounded.
    if T <= 32:
        for t in range(T):
            carry = body(t, carry)
        return carry
    return lax.fori_loop(0, T, body, carry)


def _vmem_limit_bytes(T, bb, D, H1, H2):
    f32, bf16 = 4, 2
    io = 2 * (T * bb * D * f32 + bb * f32)                    # x block + out (dbl-buffered)
    w = 2 * ((D + H1) * 4 * H1 * bf16 + 4 * H1 * f32
             + (H1 + H2) * 4 * H2 * bf16 + 4 * H2 * f32
             + (H2 + 1) * f32)
    scr = T * bb * (4 * H1 + H1 + 4 * H2) * f32               # gx1 + h1seq + gx2
    need = io + w + scr
    return int(max(32 * 1024 * 1024, 2 * need))


# ---------------------------------------------------------------------------
# Fused kernel: layer-1 LSTM -> (VMEM) -> layer-2 LSTM -> dense on last step.
# grid=(batch_blocks,) marked "parallel"; all operands resident in VMEM.
# ---------------------------------------------------------------------------
def _fused_lstm_dense_kernel(
    x_ref,      # (T, BB, D)   f32 time-major input block
    wih1_ref,   # (D, 4*H1)    bf16, gate cols ordered (i,f,o,g)
    whh1_ref,   # (H1, 4*H1)   bf16
    b1_ref,     # (1, 4*H1)    f32, b_ih + b_hh
    wih2_ref,   # (H1, 4*H2)   bf16
    whh2_ref,   # (H2, 4*H2)   bf16
    b2_ref,     # (1, 4*H2)    f32
    wd_ref,     # (1, H2)      f32 dense weight row
    bd_ref,     # (1, 1)       f32 dense bias
    out_ref,    # (BB, 1)      f32
    gx1_scr,    # VMEM (T, BB, 4*H1) f32
    h1seq_scr,  # VMEM (T, BB, H1)   f32
    gx2_scr,    # VMEM (T, BB, 4*H2) f32
):
    T, BB, D = x_ref.shape
    H1 = whh1_ref.shape[0]
    H2 = whh2_ref.shape[0]

    def cell(gx_t, h_prev, c_prev, whh_bf16, H):
        # gx_t already holds x_t @ W_ih^T + (b_ih + b_hh), in f32.
        gates = gx_t + jnp.dot(h_prev.astype(jnp.bfloat16), whh_bf16,
                               preferred_element_type=jnp.float32)
        # Gate columns are pre-ordered (i, f, o, g): one sigmoid over 3H lanes,
        # one tanh over H lanes.  (Production H1=256/H2=128 make every slice
        # lane-aligned; the toy 32/16 config uses sub-vreg lane slices.)
        ifo = jax.nn.sigmoid(gates[:, : 3 * H])
        g = jnp.tanh(gates[:, 3 * H:])
        i, f, o = ifo[:, :H], ifo[:, H:2 * H], ifo[:, 2 * H:]
        c_new = f * c_prev + i * g
        h_new = o * jnp.tanh(c_new)
        return h_new, c_new

    # ---- Layer 1: hoisted bf16 input projection (one MXU matmul for all t) ----
    x_all = x_ref[...].reshape(T * BB, D).astype(jnp.bfloat16)
    gx1_scr[...] = (
        jnp.dot(x_all, wih1_ref[...], preferred_element_type=jnp.float32)
        + b1_ref[...]
    ).reshape(T, BB, 4 * H1)

    whh1 = whh1_ref[...]

    def l1_step(t, carry):
        h, c = carry
        h, c = cell(gx1_scr[t], h, c, whh1, H1)
        h1seq_scr[t] = h
        return (h, c)

    _time_loop(T, l1_step, (jnp.zeros((BB, H1), jnp.float32),
                            jnp.zeros((BB, H1), jnp.float32)))

    # Dropout between layers == identity at inference.

    # ---- Layer 2: hoisted bf16 input projection over the whole h1 sequence ----
    h1_all = h1seq_scr[...].reshape(T * BB, H1).astype(jnp.bfloat16)
    gx2_scr[...] = (
        jnp.dot(h1_all, wih2_ref[...], preferred_element_type=jnp.float32)
        + b2_ref[...]
    ).reshape(T, BB, 4 * H2)

    whh2 = whh2_ref[...]

    def l2_step(t, carry):
        h, c = carry
        return cell(gx2_scr[t], h, c, whh2, H2)

    h2, _ = _time_loop(T, l2_step, (jnp.zeros((BB, H2), jnp.float32),
                                    jnp.zeros((BB, H2), jnp.float32)))

    # ---- Dense head on last timestep: VPU multiply + lane reduce ----
    out = jnp.sum(h2 * wd_ref[...], axis=-1, keepdims=True) + bd_ref[...]
    out_ref[...] = out.astype(out_ref.dtype)


# ---------------------------------------------------------------------------
# Parameter handling
# ---------------------------------------------------------------------------
def init_params(key, input_dim, hidden_size):
    """Raw PyTorch-layout parameters (W_ih: (4H, in), W_hh: (4H, H), ...)."""
    h1 = hidden_size
    h2 = hidden_size // 2
    ks = jax.random.split(key, 10)

    def u(k, shape, fan):
        bound = 1.0 / jnp.sqrt(fan)
        return jax.random.uniform(k, shape, jnp.float32, -bound, bound)

    return {
        "w_ih1": u(ks[0], (4 * h1, input_dim), h1),
        "w_hh1": u(ks[1], (4 * h1, h1), h1),
        "b_ih1": u(ks[2], (4 * h1,), h1),
        "b_hh1": u(ks[3], (4 * h1,), h1),
        "w_ih2": u(ks[4], (4 * h2, h1), h2),
        "w_hh2": u(ks[5], (4 * h2, h2), h2),
        "b_ih2": u(ks[6], (4 * h2,), h2),
        "b_hh2": u(ks[7], (4 * h2,), h2),
        "w_d": u(ks[8], (1, h2), h2),
        "b_d": u(ks[9], (1,), h2),
    }


def prepare_params(raw):
    """Done ONCE: reorder gates (i,f,g,o)->(i,f,o,g), pre-transpose weights to
    (in, 4H) layout, fuse biases, and cast MXU operands to bf16."""
    h1 = raw["w_hh1"].shape[1]
    h2 = raw["w_hh2"].shape[1]

    def reorder(w, H):  # rows grouped i,f,g,o -> i,f,o,g
        return jnp.concatenate([w[: 2 * H], w[3 * H: 4 * H], w[2 * H: 3 * H]],
                               axis=0)

    return {
        "wih1": jnp.transpose(reorder(raw["w_ih1"], h1)).astype(jnp.bfloat16),
        "whh1": jnp.transpose(reorder(raw["w_hh1"], h1)).astype(jnp.bfloat16),
        "b1": reorder(raw["b_ih1"] + raw["b_hh1"], h1).reshape(1, -1)
              .astype(jnp.float32),
        "wih2": jnp.transpose(reorder(raw["w_ih2"], h2)).astype(jnp.bfloat16),
        "whh2": jnp.transpose(reorder(raw["w_hh2"], h2)).astype(jnp.bfloat16),
        "b2": reorder(raw["b_ih2"] + raw["b_hh2"], h2).reshape(1, -1)
              .astype(jnp.float32),
        "wd": raw["w_d"].reshape(1, -1).astype(jnp.float32),
        "bd": raw["b_d"].reshape(1, 1).astype(jnp.float32),
    }


# ---------------------------------------------------------------------------
# Forward
# ---------------------------------------------------------------------------
@functools.partial(jax.jit, static_argnames=("batch_block",))
def lstm_model_forward(prep, x_btd, batch_block=None):
    """x_btd: (B, T, D) batch_first, like PyTorch. Returns (B, 1)."""
    B, T, D = x_btd.shape
    H1 = prep["whh1"].shape[0]
    H2 = prep["whh2"].shape[0]

    # Sublane-aligned batch block (set batch_block=B_pad//2 on v7x to use both
    # TensorCores for large batches; default = one block).
    bb = _round_up(B, 8) if batch_block is None else _round_up(batch_block, 8)
    B_pad = _round_up(B, bb)
    num_blocks = B_pad // bb

    # (B, T, D) -> time-major (T, B_pad, D), zero-padded batch rows.
    # TODO(synk): for production sizes feed time-major data upstream to avoid
    # this extra HBM read+write of x.
    x_tbd = jnp.transpose(x_btd, (1, 0, 2)).astype(jnp.float32)
    x_tbd = jnp.pad(x_tbd, ((0, 0), (0, B_pad - B), (0, 0)))

    out = pl.pallas_call(
        _fused_lstm_dense_kernel,
        out_shape=jax.ShapeDtypeStruct((B_pad, 1), jnp.float32),
        grid=(num_blocks,),
        in_specs=[
            pl.BlockSpec((T, bb, D), lambda b: (0, b, 0)),
            pl.BlockSpec((D, 4 * H1), lambda b: (0, 0)),
            pl.BlockSpec((H1, 4 * H1), lambda b: (0, 0)),
            pl.BlockSpec((1, 4 * H1), lambda b: (0, 0)),
            pl.BlockSpec((H1, 4 * H2), lambda b: (0, 0)),
            pl.BlockSpec((H2, 4 * H2), lambda b: (0, 0)),
            pl.BlockSpec((1, 4 * H2), lambda b: (0, 0)),
            pl.BlockSpec((1, H2), lambda b: (0, 0)),
            pl.BlockSpec((1, 1), lambda b: (0, 0)),
        ],
        out_specs=pl.BlockSpec((bb, 1), lambda b: (b, 0)),
        scratch_shapes=[
            pltpu.VMEM((T, bb, 4 * H1), jnp.float32),   # gx1
            pltpu.VMEM((T, bb, H1), jnp.float32),       # h1 sequence
            pltpu.VMEM((T, bb, 4 * H2), jnp.float32),   # gx2
        ],
        compiler_params=pltpu.CompilerParams(
            dimension_semantics=("parallel",),
            vmem_limit_bytes=_vmem_limit_bytes(T, bb, D, H1, H2),
        ),
    )(
        x_tbd,
        prep["wih1"], prep["whh1"], prep["b1"],
        prep["wih2"], prep["whh2"], prep["b2"],
        prep["wd"], prep["bd"],
    )
    return out[:B]


# ---------------------------------------------------------------------------
# Pure-JAX reference (PyTorch semantics) for a correctness sanity check.
# ---------------------------------------------------------------------------
def _ref_lstm(x_tbd, w_ih, w_hh, b_ih, b_hh):
    T, B, _ = x_tbd.shape
    H = w_hh.shape[1]

    def step(carry, x_t):
        h, c = carry
        gates = x_t @ w_ih.T + h @ w_hh.T + b_ih + b_hh
        i, f, g, o = jnp.split(gates, 4, axis=-1)
        i = jax.nn.sigmoid(i)
        f = jax.nn.sigmoid(f)
        g = jnp.tanh(g)
        o = jax.nn.sigmoid(o)
        c = f * c + i * g
        h = o * jnp.tanh(c)
        return (h, c), h

    init = (jnp.zeros((B, H), jnp.float32), jnp.zeros((B, H), jnp.float32))
    _, hs = jax.lax.scan(step, init, x_tbd)
    return hs


def _reference_forward(raw, x_btd):
    x_tbd = jnp.transpose(x_btd, (1, 0, 2)).astype(jnp.float32)
    h1 = _ref_lstm(x_tbd, raw["w_ih1"], raw["w_hh1"], raw["b_ih1"], raw["b_hh1"])
    h2 = _ref_lstm(h1, raw["w_ih2"], raw["w_hh2"], raw["b_ih2"], raw["b_hh2"])
    return h2[-1] @ raw["w_d"].T + raw["b_d"]


if __name__ == "__main__":
    B, T, D = 2, 8, 8
    HIDDEN = 32   # lstm1 hidden; lstm2 hidden = 16 (module default 256/128 is
                  # fully lane-aligned; this is the small test config).

    key = jax.random.PRNGKey(0)
    pkey, xkey = jax.random.split(key)
    raw = init_params(pkey, D, HIDDEN)
    prep = prepare_params(raw)
    x = jax.random.normal(xkey, (B, T, D), dtype=jnp.float32)

    out = lstm_model_forward(prep, x)
    jax.block_until_ready(out)
    assert out.shape == (B, 1), out.shape

    ref = _reference_forward(raw, x)
    # bf16 MXU operands (f32 accumulation / state) -> slightly looser tolerance
    # than a pure-f32 kernel.
    assert jnp.allclose(out, ref, atol=1e-2, rtol=1e-2), (out, ref)

    print("KERNEL_OK")
</pallas_src>

<mosaic_0001>
module attributes {stable_mosaic.version = 11 : i64} {
  func.func @_fused_lstm_dense_kernel(%arg0: i32, %arg1: memref<8x8x8xf32, #tpu.memory_space<vmem>>, %arg2: memref<8x128xbf16, #tpu.memory_space<vmem>>, %arg3: memref<32x128xbf16, #tpu.memory_space<vmem>>, %arg4: memref<1x128xf32, #tpu.memory_space<vmem>>, %arg5: memref<32x64xbf16, #tpu.memory_space<vmem>>, %arg6: memref<16x64xbf16, #tpu.memory_space<vmem>>, %arg7: memref<1x64xf32, #tpu.memory_space<vmem>>, %arg8: memref<1x16xf32, #tpu.memory_space<vmem>>, %arg9: memref<1x1xf32, #tpu.memory_space<vmem>>, %arg10: memref<8x1xf32, #tpu.memory_space<vmem>>, %arg11: memref<8x8x128xf32, #tpu.memory_space<vmem>>, %arg12: memref<8x8x32xf32, #tpu.memory_space<vmem>>, %arg13: memref<8x8x64xf32, #tpu.memory_space<vmem>>) attributes {dimension_semantics = [#tpu.dimension_semantics<parallel>], iteration_bounds = array<i64: 1>, scalar_prefetch = 0 : i64, scratch_operands = 3 : i64, tpu.core_type = #tpu.core_type<tc>, window_params = [{transform_indices = @transform_0, window_bounds = array<i64: 8, 8, 8>}, {pipeline_mode = #tpu.pipeline_mode<synchronous>, transform_indices = @transform_1, window_bounds = array<i64: 8, 128>}, {pipeline_mode = #tpu.pipeline_mode<synchronous>, transform_indices = @transform_2, window_bounds = array<i64: 32, 128>}, {pipeline_mode = #tpu.pipeline_mode<synchronous>, transform_indices = @transform_3, window_bounds = array<i64: 1, 128>}, {pipeline_mode = #tpu.pipeline_mode<synchronous>, transform_indices = @transform_4, window_bounds = array<i64: 32, 64>}, {pipeline_mode = #tpu.pipeline_mode<synchronous>, transform_indices = @transform_5, window_bounds = array<i64: 16, 64>}, {pipeline_mode = #tpu.pipeline_mode<synchronous>, transform_indices = @transform_6, window_bounds = array<i64: 1, 64>}, {pipeline_mode = #tpu.pipeline_mode<synchronous>, transform_indices = @transform_7, window_bounds = array<i64: 1, 16>}, {pipeline_mode = #tpu.pipeline_mode<synchronous>, transform_indices = @transform_8, window_bounds = array<i64: 1, 1>}, {transform_indices = @transform_9, window_bounds = array<i64: 8, 1>}]} {
    %c0 = arith.constant 0 : index
    %c0_0 = arith.constant 0 : index
    %c0_1 = arith.constant 0 : index
    %0 = vector.load %arg1[%c0, %c0_0, %c0_1] : memref<8x8x8xf32, #tpu.memory_space<vmem>>, vector<8x8x8xf32>
    %1 = vector.shape_cast %0 : vector<8x8x8xf32> to vector<64x8xf32>
    %2 = arith.truncf %1 : vector<64x8xf32> to vector<64x8xbf16>
    %c0_2 = arith.constant 0 : index
    %c0_3 = arith.constant 0 : index
    %3 = vector.load %arg2[%c0_2, %c0_3] : memref<8x128xbf16, #tpu.memory_space<vmem>>, vector<8x128xbf16>
    %cst = arith.constant dense<0.000000e+00> : vector<64x128xf32>
    %4 = tpu.matmul %2, %3, %cst {dimension_numbers = #tpu.dot_dimension_numbers<[1], [0], [0], [1], [0, 0, 1, 1], [], []>} : vector<64x8xbf16>, vector<8x128xbf16>, vector<64x128xf32> -> vector<64x128xf32>
    %c0_4 = arith.constant 0 : index
    %c0_5 = arith.constant 0 : index
    %5 = vector.load %arg4[%c0_4, %c0_5] : memref<1x128xf32, #tpu.memory_space<vmem>>, vector<1x128xf32>
    %6 = vector.broadcast %5 : vector<1x128xf32> to vector<64x128xf32>
    %7 = arith.addf %4, %6 : vector<64x128xf32>
    %8 = vector.shape_cast %7 : vector<64x128xf32> to vector<8x8x128xf32>
    %c0_6 = arith.constant 0 : index
    %c0_7 = arith.constant 0 : index
    %c0_8 = arith.constant 0 : index
    %9 = vector.load %arg11[%c0_6, %c0_7, %c0_8] : memref<8x8x128xf32, #tpu.memory_space<vmem>>, vector<8x8x128xf32>
    tpu.vector_store %arg11[%c0_6, %c0_7, %c0_8], %8 {strides = array<i32>} : memref<8x8x128xf32, #tpu.memory_space<vmem>>, vector<8x8x128xf32>,
    %c0_9 = arith.constant 0 : index
    %c0_10 = arith.constant 0 : index
    %10 = vector.load %arg3[%c0_9, %c0_10] : memref<32x128xbf16, #tpu.memory_space<vmem>>, vector<32x128xbf16>
    %cst_11 = arith.constant 0.000000e+00 : f32
    %11 = vector.broadcast %cst_11 : f32 to vector<8x32xf32>
    %cst_12 = arith.constant 0.000000e+00 : f32
    %12 = vector.broadcast %cst_12 : f32 to vector<8x32xf32>
    %c0_13 = arith.constant 0 : index
    %c0_14 = arith.constant 0 : index
    %c0_15 = arith.constant 0 : index
    %13 = vector.load %arg11[%c0_13, %c0_14, %c0_15] : memref<8x8x128xf32, #tpu.memory_space<vmem>>, vector<1x8x128xf32>
    %14 = vector.shape_cast %13 : vector<1x8x128xf32> to vector<8x128xf32>
    %15 = arith.truncf %11 : vector<8x32xf32> to vector<8x32xbf16>
    %cst_16 = arith.constant dense<0.000000e+00> : vector<8x128xf32>
    %16 = tpu.matmul %15, %10, %cst_16 {dimension_numbers = #tpu.dot_dimension_numbers<[1], [0], [0], [1], [0, 0, 1, 1], [], []>} : vector<8x32xbf16>, vector<32x128xbf16>, vector<8x128xf32> -> vector<8x128xf32>
    %17 = arith.addf %14, %16 : vector<8x128xf32>
    %18 = vector.extract_strided_slice %17 {offsets = [0, 0], sizes = [8, 96], strides = [1, 1]} : vector<8x128xf32> to vector<8x96xf32>
    %19 = arith.negf %18 : vector<8x96xf32>
    %20 = math.exp %19 : vector<8x96xf32>
    %cst_17 = arith.constant 1.000000e+00 : f32
    %21 = vector.broadcast %cst_17 : f32 to vector<8x96xf32>
    %22 = arith.addf %21, %20 : vector<8x96xf32>
    %23 = arith.divf %21, %22 : vector<8x96xf32>
    %24 = vector.extract_strided_slice %17 {offsets = [0, 96], sizes = [8, 32], strides = [1, 1]} : vector<8x128xf32> to vector<8x32xf32>
    %25 = math.tanh %24 : vector<8x32xf32>
    %26 = vector.extract_strided_slice %23 {offsets = [0, 0], sizes = [8, 32], strides = [1, 1]} : vector<8x96xf32> to vector<8x32xf32>
    %27 = vector.extract_strided_slice %23 {offsets = [0, 32], sizes = [8, 32], strides = [1, 1]} : vector<8x96xf32> to vector<8x32xf32>
    %28 = vector.extract_strided_slice %23 {offsets = [0, 64], sizes = [8, 32], strides = [1, 1]} : vector<8x96xf32> to vector<8x32xf32>
    %29 = arith.mulf %27, %12 : vector<8x32xf32>
    %30 = arith.mulf %26, %25 : vector<8x32xf32>
    %31 = arith.addf %29, %30 : vector<8x32xf32>
    %32 = math.tanh %31 : vector<8x32xf32>
    %33 = arith.mulf %28, %32 : vector<8x32xf32>
    %c0_18 = arith.constant 0 : index
    %c0_19 = arith.constant 0 : index
    %c0_20 = arith.constant 0 : index
    %34 = vector.load %arg12[%c0_18, %c0_19, %c0_20] : memref<8x8x32xf32, #tpu.memory_space<vmem>>, vector<1x8x32xf32>
    %35 = vector.shape_cast %34 : vector<1x8x32xf32> to vector<8x32xf32>
    %36 = vector.shape_cast %33 : vector<8x32xf32> to vector<1x8x32xf32>
    tpu.vector_store %arg12[%c0_18, %c0_19, %c0_20], %36 {strides = array<i32>} : memref<8x8x32xf32, #tpu.memory_space<vmem>>, vector<1x8x32xf32>,
    %c1 = arith.constant 1 : index
    %c0_21 = arith.constant 0 : index
    %c0_22 = arith.constant 0 : index
    %37 = vector.load %arg11[%c1, %c0_21, %c0_22] : memref<8x8x128xf32, #tpu.memory_space<vmem>>, vector<1x8x128xf32>
    %38 = vector.shape_cast %37 : vector<1x8x128xf32> to vector<8x128xf32>
    %39 = arith.truncf %33 : vector<8x32xf32> to vector<8x32xbf16>
    %cst_23 = arith.constant dense<0.000000e+00> : vector<8x128xf32>
    %40 = tpu.matmul %39, %10, %cst_23 {dimension_numbers = #tpu.dot_dimension_numbers<[1], [0], [0], [1], [0, 0, 1, 1], [], []>} : vector<8x32xbf16>, vector<32x128xbf16>, vector<8x128xf32> -> vector<8x128xf32>
    %41 = arith.addf %38, %40 : vector<8x128xf32>
    %42 = vector.extract_strided_slice %41 {offsets = [0, 0], sizes = [8, 96], strides = [1, 1]} : vector<8x128xf32> to vector<8x96xf32>
    %43 = arith.negf %42 : vector<8x96xf32>
    %44 = math.exp %43 : vector<8x96xf32>
    %cst_24 = arith.constant 1.000000e+00 : f32
    %45 = vector.broadcast %cst_24 : f32 to vector<8x96xf32>
    %46 = arith.addf %45, %44 : vector<8x96xf32>
    %47 = arith.divf %45, %46 : vector<8x96xf32>
    %48 = vector.extract_strided_slice %41 {offsets = [0, 96], sizes = [8, 32], strides = [1, 1]} : vector<8x128xf32> to vector<8x32xf32>
    %49 = math.tanh %48 : vector<8x32xf32>
    %50 = vector.extract_strided_slice %47 {offsets = [0, 0], sizes = [8, 32], strides = [1, 1]} : vector<8x96xf32> to vector<8x32xf32>
    %51 = vector.extract_strided_slice %47 {offsets = [0, 32], sizes = [8, 32], strides = [1, 1]} : vector<8x96xf32> to vector<8x32xf32>
    %52 = vector.extract_strided_slice %47 {offsets = [0, 64], sizes = [8, 32], strides = [1, 1]} : vector<8x96xf32> to vector<8x32xf32>
    %53 = arith.mulf %51, %31 : vector<8x32xf32>
    %54 = arith.mulf %50, %49 : vector<8x32xf32>
    %55 = arith.addf %53, %54 : vector<8x32xf32>
    %56 = math.tanh %55 : vector<8x32xf32>
    %57 = arith.mulf %52, %56 : vector<8x32xf32>
    %c1_25 = arith.constant 1 : index
    %c0_26 = arith.constant 0 : index
    %c0_27 = arith.constant 0 : index
    %58 = vector.load %arg12[%c1_25, %c0_26, %c0_27] : memref<8x8x32xf32, #tpu.memory_space<vmem>>, vector<1x8x32xf32>
    %59 = vector.shape_cast %58 : vector<1x8x32xf32> to vector<8x32xf32>
    %60 = vector.shape_cast %57 : vector<8x32xf32> to vector<1x8x32xf32>
    tpu.vector_store %arg12[%c1_25, %c0_26, %c0_27], %60 {strides = array<i32>} : memref<8x8x32xf32, #tpu.memory_space<vmem>>, vector<1x8x32xf32>,
    %c2 = arith.constant 2 : index
    %c0_28 = arith.constant 0 : index
    %c0_29 = arith.constant 0 : index
    %61 = vector.load %arg11[%c2, %c0_28, %c0_29] : memref<8x8x128xf32, #tpu.memory_space<vmem>>, vector<1x8x128xf32>
    %62 = vector.shape_cast %61 : vector<1x8x128xf32> to vector<8x128xf32>
    %63 = arith.truncf %57 : vector<8x32xf32> to vector<8x32xbf16>
    %cst_30 = arith.constant dense<0.000000e+00> : vector<8x128xf32>
    %64 = tpu.matmul %63, %10, %cst_30 {dimension_numbers = #tpu.dot_dimension_numbers<[1], [0], [0], [1], [0, 0, 1, 1], [], []>} : vector<8x32xbf16>, vector<32x128xbf16>, vector<8x128xf32> -> vector<8x128xf32>
    %65 = arith.addf %62, %64 : vector<8x128xf32>
    %66 = vector.extract_strided_slice %65 {offsets = [0, 0], sizes = [8, 96], strides = [1, 1]} : vector<8x128xf32> to vector<8x96xf32>
    %67 = arith.negf %66 : vector<8x96xf32>
    %68 = math.exp %67 : vector<8x96xf32>
    %cst_31 = arith.constant 1.000000e+00 : f32
    %69 = vector.broadcast %cst_31 : f32 to vector<8x96xf32>
    %70 = arith.addf %69, %68 : vector<8x96xf32>
    %71 = arith.divf %69, %70 : vector<8x96xf32>
    %72 = vector.extract_strided_slice %65 {offsets = [0, 96], sizes = [8, 32], strides = [1, 1]} : vector<8x128xf32> to vector<8x32xf32>
    %73 = math.tanh %72 : vector<8x32xf32>
    %74 = vector.extract_strided_slice %71 {offsets = [0, 0], sizes = [8, 32], strides = [1, 1]} : vector<8x96xf32> to vector<8x32xf32>
    %75 = vector.extract_strided_slice %71 {offsets = [0, 32], sizes = [8, 32], strides = [1, 1]} : vector<8x96xf32> to vector<8x32xf32>
    %76 = vector.extract_strided_slice %71 {offsets = [0, 64], sizes = [8, 32], strides = [1, 1]} : vector<8x96xf32> to vector<8x32xf32>
    %77 = arith.mulf %75, %55 : vector<8x32xf32>
    %78 = arith.mulf %74, %73 : vector<8x32xf32>
    %79 = arith.addf %77, %78 : vector<8x32xf32>
    %80 = math.tanh %79 : vector<8x32xf32>
    %81 = arith.mulf %76, %80 : vector<8x32xf32>
    %c2_32 = arith.constant 2 : index
    %c0_33 = arith.constant 0 : index
    %c0_34 = arith.constant 0 : index
    %82 = vector.load %arg12[%c2_32, %c0_33, %c0_34] : memref<8x8x32xf32, #tpu.memory_space<vmem>>, vector<1x8x32xf32>
    %83 = vector.shape_cast %82 : vector<1x8x32xf32> to vector<8x32xf32>
    %84 = vector.shape_cast %81 : vector<8x32xf32> to vector<1x8x32xf32>
    tpu.vector_store %arg12[%c2_32, %c0_33, %c0_34], %84 {strides = array<i32>} : memref<8x8x32xf32, #tpu.memory_space<vmem>>, vector<1x8x32xf32>,
    %c3 = arith.constant 3 : index
    %c0_35 = arith.constant 0 : index
    %c0_36 = arith.constant 0 : index
    %85 = vector.load %arg11[%c3, %c0_35, %c0_36] : memref<8x8x128xf32, #tpu.memory_space<vmem>>, vector<1x8x128xf32>
    %86 = vector.shape_cast %85 : vector<1x8x128xf32> to vector<8x128xf32>
    %87 = arith.truncf %81 : vector<8x32xf32> to vector<8x32xbf16>
    %cst_37 = arith.constant dense<0.000000e+00> : vector<8x128xf32>
    %88 = tpu.matmul %87, %10, %cst_37 {dimension_numbers = #tpu.dot_dimension_numbers<[1], [0], [0], [1], [0, 0, 1, 1], [], []>} : vector<8x32xbf16>, vector<32x128xbf16>, vector<8x128xf32> -> vector<8x128xf32>
    %89 = arith.addf %86, %88 : vector<8x128xf32>
    %90 = vector.extract_strided_slice %89 {offsets = [0, 0], sizes = [8, 96], strides = [1, 1]} : vector<8x128xf32> to vector<8x96xf32>
    %91 = arith.negf %90 : vector<8x96xf32>
    %92 = math.exp %91 : vector<8x96xf32>
    %cst_38 = arith.constant 1.000000e+00 : f32
    %93 = vector.broadcast %cst_38 : f32 to vector<8x96xf32>
    %94 = arith.addf %93, %92 : vector<8x96xf32>
    %95 = arith.divf %93, %94 : vector<8x96xf32>
    %96 = vector.extract_strided_slice %89 {offsets = [0, 96], sizes = [8, 32], strides = [1, 1]} : vector<8x128xf32> to vector<8x32xf32>
    %97 = math.tanh %96 : vector<8x32xf32>
    %98 = vector.extract_strided_slice %95 {offsets = [0, 0], sizes = [8, 32], strides = [1, 1]} : vector<8x96xf32> to vector<8x32xf32>
    %99 = vector.extract_strided_slice %95 {offsets = [0, 32], sizes = [8, 32], strides = [1, 1]} : vector<8x96xf32> to vector<8x32xf32>
    %100 = vector.extract_strided_slice %95 {offsets = [0, 64], sizes = [8, 32], strides = [1, 1]} : vector<8x96xf32> to vector<8x32xf32>
    %101 = arith.mulf %99, %79 : vector<8x32xf32>
    %102 = arith.mulf %98, %97 : vector<8x32xf32>
    %103 = arith.addf %101, %102 : vector<8x32xf32>
    %104 = math.tanh %103 : vector<8x32xf32>
    %105 = arith.mulf %100, %104 : vector<8x32xf32>
    %c3_39 = arith.constant 3 : index
    %c0_40 = arith.constant 0 : index
    %c0_41 = arith.constant 0 : index
    %106 = vector.load %arg12[%c3_39, %c0_40, %c0_41] : memref<8x8x32xf32, #tpu.memory_space<vmem>>, vector<1x8x32xf32>
    %107 = vector.shape_cast %106 : vector<1x8x32xf32> to vector<8x32xf32>
    %108 = vector.shape_cast %105 : vector<8x32xf32> to vector<1x8x32xf32>
    tpu.vector_store %arg12[%c3_39, %c0_40, %c0_41], %108 {strides = array<i32>} : memref<8x8x32xf32, #tpu.memory_space<vmem>>, vector<1x8x32xf32>,
    %c4 = arith.constant 4 : index
    %c0_42 = arith.constant 0 : index
    %c0_43 = arith.constant 0 : index
    %109 = vector.load %arg11[%c4, %c0_42, %c0_43] : memref<8x8x128xf32, #tpu.memory_space<vmem>>, vector<1x8x128xf32>
    %110 = vector.shape_cast %109 : vector<1x8x128xf32> to vector<8x128xf32>
    %111 = arith.truncf %105 : vector<8x32xf32> to vector<8x32xbf16>
    %cst_44 = arith.constant dense<0.000000e+00> : vector<8x128xf32>
    %112 = tpu.matmul %111, %10, %cst_44 {dimension_numbers = #tpu.dot_dimension_numbers<[1], [0], [0], [1], [0, 0, 1, 1], [], []>} : vector<8x32xbf16>, vector<32x128xbf16>, vector<8x128xf32> -> vector<8x128xf32>
    %113 = arith.addf %110, %112 : vector<8x128xf32>
    %114 = vector.extract_strided_slice %113 {offsets = [0, 0], sizes = [8, 96], strides = [1, 1]} : vector<8x128xf32> to vector<8x96xf32>
    %115 = arith.negf %114 : vector<8x96xf32>
    %116 = math.exp %115 : vector<8x96xf32>
    %cst_45 = arith.constant 1.000000e+00 : f32
    %117 = vector.broadcast %cst_45 : f32 to vector<8x96xf32>
    %118 = arith.addf %117, %116 : vector<8x96xf32>
    %119 = arith.divf %117, %118 : vector<8x96xf32>
    %120 = vector.extract_strided_slice %113 {offsets = [0, 96], sizes = [8, 32], strides = [1, 1]} : vector<8x128xf32> to vector<8x32xf32>
    %121 = math.tanh %120 : vector<8x32xf32>
    %122 = vector.extract_strided_slice %119 {offsets = [0, 0], sizes = [8, 32], strides = [1, 1]} : vector<8x96xf32> to vector<8x32xf32>
    %123 = vector.extract_strided_slice %119 {offsets = [0, 32], sizes = [8, 32], strides = [1, 1]} : vector<8x96xf32> to vector<8x32xf32>
    %124 = vector.extract_strided_slice %119 {offsets = [0, 64], sizes = [8, 32], strides = [1, 1]} : vector<8x96xf32> to vector<8x32xf32>
    %125 = arith.mulf %123, %103 : vector<8x32xf32>
    %126 = arith.mulf %122, %121 : vector<8x32xf32>
    %127 = arith.addf %125, %126 : vector<8x32xf32>
    %128 = math.tanh %127 : vector<8x32xf32>
    %129 = arith.mulf %124, %128 : vector<8x32xf32>
    %c4_46 = arith.constant 4 : index
    %c0_47 = arith.constant 0 : index
    %c0_48 = arith.constant 0 : index
    %130 = vector.load %arg12[%c4_46, %c0_47, %c0_48] : memref<8x8x32xf32, #tpu.memory_space<vmem>>, vector<1x8x32xf32>
    %131 = vector.shape_cast %130 : vector<1x8x32xf32> to vector<8x32xf32>
    %132 = vector.shape_cast %129 : vector<8x32xf32> to vector<1x8x32xf32>
    tpu.vector_store %arg12[%c4_46, %c0_47, %c0_48], %132 {strides = array<i32>} : memref<8x8x32xf32, #tpu.memory_space<vmem>>, vector<1x8x32xf32>,
    %c5 = arith.constant 5 : index
    %c0_49 = arith.constant 0 : index
    %c0_50 = arith.constant 0 : index
    %133 = vector.load %arg11[%c5, %c0_49, %c0_50] : memref<8x8x128xf32, #tpu.memory_space<vmem>>, vector<1x8x128xf32>
    %134 = vector.shape_cast %133 : vector<1x8x128xf32> to vector<8x128xf32>
    %135 = arith.truncf %129 : vector<8x32xf32> to vector<8x32xbf16>
    %cst_51 = arith.constant dense<0.000000e+00> : vector<8x128xf32>
    %136 = tpu.matmul %135, %10, %cst_51 {dimension_numbers = #tpu.dot_dimension_numbers<[1], [0], [0], [1], [0, 0, 1, 1], [], []>} : vector<8x32xbf16>, vector<32x128xbf16>, vector<8x128xf32> -> vector<8x128xf32>
    %137 = arith.addf %134, %136 : vector<8x128xf32>
    %138 = vector.extract_strided_slice %137 {offsets = [0, 0], sizes = [8, 96], strides = [1, 1]} : vector<8x128xf32> to vector<8x96xf32>
    %139 = arith.negf %138 : vector<8x96xf32>
    %140 = math.exp %139 : vector<8x96xf32>
    %cst_52 = arith.constant 1.000000e+00 : f32
    %141 = vector.broadcast %cst_52 : f32 to vector<8x96xf32>
    %142 = arith.addf %141, %140 : vector<8x96xf32>
    %143 = arith.divf %141, %142 : vector<8x96xf32>
    %144 = vector.extract_strided_slice %137 {offsets = [0, 96], sizes = [8, 32], strides = [1, 1]} : vector<8x128xf32> to vector<8x32xf32>
    %145 = math.tanh %144 : vector<8x32xf32>
    %146 = vector.extract_strided_slice %143 {offsets = [0, 0], sizes = [8, 32], strides = [1, 1]} : vector<8x96xf32> to vector<8x32xf32>
    %147 = vector.extract_strided_slice %143 {offsets = [0, 32], sizes = [8, 32], strides = [1, 1]} : vector<8x96xf32> to vector<8x32xf32>
    %148 = vector.extract_strided_slice %143 {offsets = [0, 64], sizes = [8, 32], strides = [1, 1]} : vector<8x96xf32> to vector<8x32xf32>
    %149 = arith.mulf %147, %127 : vector<8x32xf32>
    %150 = arith.mulf %146, %145 : vector<8x32xf32>
    %151 = arith.addf %149, %150 : vector<8x32xf32>
    %152 = math.tanh %151 : vector<8x32xf32>
    %153 = arith.mulf %148, %152 : vector<8x32xf32>
    %c5_53 = arith.constant 5 : index
    %c0_54 = arith.constant 0 : index
    %c0_55 = arith.constant 0 : index
    %154 = vector.load %arg12[%c5_53, %c0_54, %c0_55] : memref<8x8x32xf32, #tpu.memory_space<vmem>>, vector<1x8x32xf32>
    %155 = vector.shape_cast %154 : vector<1x8x32xf32> to vector<8x32xf32>
    %156 = vector.shape_cast %153 : vector<8x32xf32> to vector<1x8x32xf32>
    tpu.vector_store %arg12[%c5_53, %c0_54, %c0_55], %156 {strides = array<i32>} : memref<8x8x32xf32, #tpu.memory_space<vmem>>, vector<1x8x32xf32>,
    %c6 = arith.constant 6 : index
    %c0_56 = arith.constant 0 : index
    %c0_57 = arith.constant 0 : index
    %157 = vector.load %arg11[%c6, %c0_56, %c0_57] : memref<8x8x128xf32, #tpu.memory_space<vmem>>, vector<1x8x128xf32>
    %158 = vector.shape_cast %157 : vector<1x8x128xf32> to vector<8x128xf32>
    %159 = arith.truncf %153 : vector<8x32xf32> to vector<8x32xbf16>
    %cst_58 = arith.constant dense<0.000000e+00> : vector<8x128xf32>
    %160 = tpu.matmul %159, %10, %cst_58 {dimension_numbers = #tpu.dot_dimension_numbers<[1], [0], [0], [1], [0, 0, 1, 1], [], []>} : vector<8x32xbf16>, vector<32x128xbf16>, vector<8x128xf32> -> vector<8x128xf32>
    %161 = arith.addf %158, %160 : vector<8x128xf32>
    %162 = vector.extract_strided_slice %161 {offsets = [0, 0], sizes = [8, 96], strides = [1, 1]} : vector<8x128xf32> to vector<8x96xf32>
    %163 = arith.negf %162 : vector<8x96xf32>
    %164 = math.exp %163 : vector<8x96xf32>
    %cst_59 = arith.constant 1.000000e+00 : f32
    %165 = vector.broadcast %cst_59 : f32 to vector<8x96xf32>
    %166 = arith.addf %165, %164 : vector<8x96xf32>
    %167 = arith.divf %165, %166 : vector<8x96xf32>
    %168 = vector.extract_strided_slice %161 {offsets = [0, 96], sizes = [8, 32], strides = [1, 1]} : vector<8x128xf32> to vector<8x32xf32>
    %169 = math.tanh %168 : vector<8x32xf32>
    %170 = vector.extract_strided_slice %167 {offsets = [0, 0], sizes = [8, 32], strides = [1, 1]} : vector<8x96xf32> to vector<8x32xf32>
    %171 = vector.extract_strided_slice %167 {offsets = [0, 32], sizes = [8, 32], strides = [1, 1]} : vector<8x96xf32> to vector<8x32xf32>
    %172 = vector.extract_strided_slice %167 {offsets = [0, 64], sizes = [8, 32], strides = [1, 1]} : vector<8x96xf32> to vector<8x32xf32>
    %173 = arith.mulf %171, %151 : vector<8x32xf32>
    %174 = arith.mulf %170, %169 : vector<8x32xf32>
    %175 = arith.addf %173, %174 : vector<8x32xf32>
    %176 = math.tanh %175 : vector<8x32xf32>
    %177 = arith.mulf %172, %176 : vector<8x32xf32>
    %c6_60 = arith.constant 6 : index
    %c0_61 = arith.constant 0 : index
    %c0_62 = arith.constant 0 : index
    %178 = vector.load %arg12[%c6_60, %c0_61, %c0_62] : memref<8x8x32xf32, #tpu.memory_space<vmem>>, vector<1x8x32xf32>
    %179 = vector.shape_cast %178 : vector<1x8x32xf32> to vector<8x32xf32>
    %180 = vector.shape_cast %177 : vector<8x32xf32> to vector<1x8x32xf32>
    tpu.vector_store %arg12[%c6_60, %c0_61, %c0_62], %180 {strides = array<i32>} : memref<8x8x32xf32, #tpu.memory_space<vmem>>, vector<1x8x32xf32>,
    %c7 = arith.constant 7 : index
    %c0_63 = arith.constant 0 : index
    %c0_64 = arith.constant 0 : index
    %181 = vector.load %arg11[%c7, %c0_63, %c0_64] : memref<8x8x128xf32, #tpu.memory_space<vmem>>, vector<1x8x128xf32>
    %182 = vector.shape_cast %181 : vector<1x8x128xf32> to vector<8x128xf32>
    %183 = arith.truncf %177 : vector<8x32xf32> to vector<8x32xbf16>
    %cst_65 = arith.constant dense<0.000000e+00> : vector<8x128xf32>
    %184 = tpu.matmul %183, %10, %cst_65 {dimension_numbers = #tpu.dot_dimension_numbers<[1], [0], [0], [1], [0, 0, 1, 1], [], []>} : vector<8x32xbf16>, vector<32x128xbf16>, vector<8x128xf32> -> vector<8x128xf32>
    %185 = arith.addf %182, %184 : vector<8x128xf32>
    %186 = vector.extract_strided_slice %185 {offsets = [0, 0], sizes = [8, 96], strides = [1, 1]} : vector<8x128xf32> to vector<8x96xf32>
    %187 = arith.negf %186 : vector<8x96xf32>
    %188 = math.exp %187 : vector<8x96xf32>
    %cst_66 = arith.constant 1.000000e+00 : f32
    %189 = vector.broadcast %cst_66 : f32 to vector<8x96xf32>
    %190 = arith.addf %189, %188 : vector<8x96xf32>
    %191 = arith.divf %189, %190 : vector<8x96xf32>
    %192 = vector.extract_strided_slice %185 {offsets = [0, 96], sizes = [8, 32], strides = [1, 1]} : vector<8x128xf32> to vector<8x32xf32>
    %193 = math.tanh %192 : vector<8x32xf32>
    %194 = vector.extract_strided_slice %191 {offsets = [0, 0], sizes = [8, 32], strides = [1, 1]} : vector<8x96xf32> to vector<8x32xf32>
    %195 = vector.extract_strided_slice %191 {offsets = [0, 32], sizes = [8, 32], strides = [1, 1]} : vector<8x96xf32> to vector<8x32xf32>
    %196 = vector.extract_strided_slice %191 {offsets = [0, 64], sizes = [8, 32], strides = [1, 1]} : vector<8x96xf32> to vector<8x32xf32>
    %197 = arith.mulf %195, %175 : vector<8x32xf32>
    %198 = arith.mulf %194, %193 : vector<8x32xf32>
    %199 = arith.addf %197, %198 : vector<8x32xf32>
    %200 = math.tanh %199 : vector<8x32xf32>
    %201 = arith.mulf %196, %200 : vector<8x32xf32>
    %c7_67 = arith.constant 7 : index
    %c0_68 = arith.constant 0 : index
    %c0_69 = arith.constant 0 : index
    %202 = vector.load %arg12[%c7_67, %c0_68, %c0_69] : memref<8x8x32xf32, #tpu.memory_space<vmem>>, vector<1x8x32xf32>
    %203 = vector.shape_cast %202 : vector<1x8x32xf32> to vector<8x32xf32>
    %204 = vector.shape_cast %201 : vector<8x32xf32> to vector<1x8x32xf32>
    tpu.vector_store %arg12[%c7_67, %c0_68, %c0_69], %204 {strides = array<i32>} : memref<8x8x32xf32, #tpu.memory_space<vmem>>, vector<1x8x32xf32>,
    %c0_70 = arith.constant 0 : index
    %c0_71 = arith.constant 0 : index
    %c0_72 = arith.constant 0 : index
    %205 = vector.load %arg12[%c0_70, %c0_71, %c0_72] : memref<8x8x32xf32, #tpu.memory_space<vmem>>, vector<8x8x32xf32>
    %206 = vector.shape_cast %205 : vector<8x8x32xf32> to vector<64x32xf32>
    %207 = arith.truncf %206 : vector<64x32xf32> to vector<64x32xbf16>
    %c0_73 = arith.constant 0 : index
    %c0_74 = arith.constant 0 : index
    %208 = vector.load %arg5[%c0_73, %c0_74] : memref<32x64xbf16, #tpu.memory_space<vmem>>, vector<32x64xbf16>
    %cst_75 = arith.constant dense<0.000000e+00> : vector<64x64xf32>
    %209 = tpu.matmul %207, %208, %cst_75 {dimension_numbers = #tpu.dot_dimension_numbers<[1], [0], [0], [1], [0, 0, 1, 1], [], []>} : vector<64x32xbf16>, vector<32x64xbf16>, vector<64x64xf32> -> vector<64x64xf32>
    %c0_76 = arith.constant 0 : index
    %c0_77 = arith.constant 0 : index
    %210 = vector.load %arg7[%c0_76, %c0_77] : memref<1x64xf32, #tpu.memory_space<vmem>>, vector<1x64xf32>
    %211 = vector.broadcast %210 : vector<1x64xf32> to vector<64x64xf32>
    %212 = arith.addf %209, %211 : vector<64x64xf32>
    %213 = vector.shape_cast %212 : vector<64x64xf32> to vector<8x8x64xf32>
    %c0_78 = arith.constant 0 : index
    %c0_79 = arith.constant 0 : index
    %c0_80 = arith.constant 0 : index
    %214 = vector.load %arg13[%c0_78, %c0_79, %c0_80] : memref<8x8x64xf32, #tpu.memory_space<vmem>>, vector<8x8x64xf32>
    tpu.vector_store %arg13[%c0_78, %c0_79, %c0_80], %213 {strides = array<i32>} : memref<8x8x64xf32, #tpu.memory_space<vmem>>, vector<8x8x64xf32>,
    %c0_81 = arith.constant 0 : index
    %c0_82 = arith.constant 0 : index
    %215 = vector.load %arg6[%c0_81, %c0_82] : memref<16x64xbf16, #tpu.memory_space<vmem>>, vector<16x64xbf16>
    %cst_83 = arith.constant 0.000000e+00 : f32
    %216 = vector.broadcast %cst_83 : f32 to vector<8x16xf32>
    %cst_84 = arith.constant 0.000000e+00 : f32
    %217 = vector.broadcast %cst_84 : f32 to vector<8x16xf32>
    %c0_85 = arith.constant 0 : index
    %c0_86 = arith.constant 0 : index
    %c0_87 = arith.constant 0 : index
    %218 = vector.load %arg13[%c0_85, %c0_86, %c0_87] : memref<8x8x64xf32, #tpu.memory_space<vmem>>, vector<1x8x64xf32>
    %219 = vector.shape_cast %218 : vector<1x8x64xf32> to vector<8x64xf32>
    %220 = arith.truncf %216 : vector<8x16xf32> to vector<8x16xbf16>
    %cst_88 = arith.constant dense<0.000000e+00> : vector<8x64xf32>
    %221 = tpu.matmul %220, %215, %cst_88 {dimension_numbers = #tpu.dot_dimension_numbers<[1], [0], [0], [1], [0, 0, 1, 1], [], []>} : vector<8x16xbf16>, vector<16x64xbf16>, vector<8x64xf32> -> vector<8x64xf32>
    %222 = arith.addf %219, %221 : vector<8x64xf32>
    %223 = vector.extract_strided_slice %222 {offsets = [0, 0], sizes = [8, 48], strides = [1, 1]} : vector<8x64xf32> to vector<8x48xf32>
    %224 = arith.negf %223 : vector<8x48xf32>
    %225 = math.exp %224 : vector<8x48xf32>
    %cst_89 = arith.constant 1.000000e+00 : f32
    %226 = vector.broadcast %cst_89 : f32 to vector<8x48xf32>
    %227 = arith.addf %226, %225 : vector<8x48xf32>
    %228 = arith.divf %226, %227 : vector<8x48xf32>
    %229 = vector.extract_strided_slice %222 {offsets = [0, 48], sizes = [8, 16], strides = [1, 1]} : vector<8x64xf32> to vector<8x16xf32>
    %230 = math.tanh %229 : vector<8x16xf32>
    %231 = vector.extract_strided_slice %228 {offsets = [0, 0], sizes = [8, 16], strides = [1, 1]} : vector<8x48xf32> to vector<8x16xf32>
    %232 = vector.extract_strided_slice %228 {offsets = [0, 16], sizes = [8, 16], strides = [1, 1]} : vector<8x48xf32> to vector<8x16xf32>
    %233 = vector.extract_strided_slice %228 {offsets = [0, 32], sizes = [8, 16], strides = [1, 1]} : vector<8x48xf32> to vector<8x16xf32>
    %234 = arith.mulf %232, %217 : vector<8x16xf32>
    %235 = arith.mulf %231, %230 : vector<8x16xf32>
    %236 = arith.addf %234, %235 : vector<8x16xf32>
    %237 = math.tanh %236 : vector<8x16xf32>
    %238 = arith.mulf %233, %237 : vector<8x16xf32>
    %c1_90 = arith.constant 1 : index
    %c0_91 = arith.constant 0 : index
    %c0_92 = arith.constant 0 : index
    %239 = vector.load %arg13[%c1_90, %c0_91, %c0_92] : memref<8x8x64xf32, #tpu.memory_space<vmem>>, vector<1x8x64xf32>
    %240 = vector.shape_cast %239 : vector<1x8x64xf32> to vector<8x64xf32>
    %241 = arith.truncf %238 : vector<8x16xf32> to vector<8x16xbf16>
    %cst_93 = arith.constant dense<0.000000e+00> : vector<8x64xf32>
    %242 = tpu.matmul %241, %215, %cst_93 {dimension_numbers = #tpu.dot_dimension_numbers<[1], [0], [0], [1], [0, 0, 1, 1], [], []>} : vector<8x16xbf16>, vector<16x64xbf16>, vector<8x64xf32> -> vector<8x64xf32>
    %243 = arith.addf %240, %242 : vector<8x64xf32>
    %244 = vector.extract_strided_slice %243 {offsets = [0, 0], sizes = [8, 48], strides = [1, 1]} : vector<8x64xf32> to vector<8x48xf32>
    %245 = arith.negf %244 : vector<8x48xf32>
    %246 = math.exp %245 : vector<8x48xf32>
    %cst_94 = arith.constant 1.000000e+00 : f32
    %247 = vector.broadcast %cst_94 : f32 to vector<8x48xf32>
    %248 = arith.addf %247, %246 : vector<8x48xf32>
    %249 = arith.divf %247, %248 : vector<8x48xf32>
    %250 = vector.extract_strided_slice %243 {offsets = [0, 48], sizes = [8, 16], strides = [1, 1]} : vector<8x64xf32> to vector<8x16xf32>
    %251 = math.tanh %250 : vector<8x16xf32>
    %252 = vector.extract_strided_slice %249 {offsets = [0, 0], sizes = [8, 16], strides = [1, 1]} : vector<8x48xf32> to vector<8x16xf32>
    %253 = vector.extract_strided_slice %249 {offsets = [0, 16], sizes = [8, 16], strides = [1, 1]} : vector<8x48xf32> to vector<8x16xf32>
    %254 = vector.extract_strided_slice %249 {offsets = [0, 32], sizes = [8, 16], strides = [1, 1]} : vector<8x48xf32> to vector<8x16xf32>
    %255 = arith.mulf %253, %236 : vector<8x16xf32>
    %256 = arith.mulf %252, %251 : vector<8x16xf32>
    %257 = arith.addf %255, %256 : vector<8x16xf32>
    %258 = math.tanh %257 : vector<8x16xf32>
    %259 = arith.mulf %254, %258 : vector<8x16xf32>
    %c2_95 = arith.constant 2 : index
    %c0_96 = arith.constant 0 : index
    %c0_97 = arith.constant 0 : index
    %260 = vector.load %arg13[%c2_95, %c0_96, %c0_97] : memref<8x8x64xf32, #tpu.memory_space<vmem>>, vector<1x8x64xf32>
    %261 = vector.shape_cast %260 : vector<1x8x64xf32> to vector<8x64xf32>
    %262 = arith.truncf %259 : vector<8x16xf32> to vector<8x16xbf16>
    %cst_98 = arith.constant dense<0.000000e+00> : vector<8x64xf32>
    %263 = tpu.matmul %262, %215, %cst_98 {dimension_numbers = #tpu.dot_dimension_numbers<[1], [0], [0], [1], [0, 0, 1, 1], [], []>} : vector<8x16xbf16>, vector<16x64xbf16>, vector<8x64xf32> -> vector<8x64xf32>
    %264 = arith.addf %261, %263 : vector<8x64xf32>
    %265 = vector.extract_strided_slice %264 {offsets = [0, 0], sizes = [8, 48], strides = [1, 1]} : vector<8x64xf32> to vector<8x48xf32>
    %266 = arith.negf %265 : vector<8x48xf32>
    %267 = math.exp %266 : vector<8x48xf32>
    %cst_99 = arith.constant 1.000000e+00 : f32
    %268 = vector.broadcast %cst_99 : f32 to vector<8x48xf32>
    %269 = arith.addf %268, %267 : vector<8x48xf32>
    %270 = arith.divf %268, %269 : vector<8x48xf32>
    %271 = vector.extract_strided_slice %264 {offsets = [0, 48], sizes = [8, 16], strides = [1, 1]} : vector<8x64xf32> to vector<8x16xf32>
    %272 = math.tanh %271 : vector<8x16xf32>
    %273 = vector.extract_strided_slice %270 {offsets = [0, 0], sizes = [8, 16], strides = [1, 1]} : vector<8x48xf32> to vector<8x16xf32>
    %274 = vector.extract_strided_slice %270 {offsets = [0, 16], sizes = [8, 16], strides = [1, 1]} : vector<8x48xf32> to vector<8x16xf32>
    %275 = vector.extract_strided_slice %270 {offsets = [0, 32], sizes = [8, 16], strides = [1, 1]} : vector<8x48xf32> to vector<8x16xf32>
    %276 = arith.mulf %274, %257 : vector<8x16xf32>
    %277 = arith.mulf %273, %272 : vector<8x16xf32>
    %278 = arith.addf %276, %277 : vector<8x16xf32>
    %279 = math.tanh %278 : vector<8x16xf32>
    %280 = arith.mulf %275, %279 : vector<8x16xf32>
    %c3_100 = arith.constant 3 : index
    %c0_101 = arith.constant 0 : index
    %c0_102 = arith.constant 0 : index
    %281 = vector.load %arg13[%c3_100, %c0_101, %c0_102] : memref<8x8x64xf32, #tpu.memory_space<vmem>>, vector<1x8x64xf32>
    %282 = vector.shape_cast %281 : vector<1x8x64xf32> to vector<8x64xf32>
    %283 = arith.truncf %280 : vector<8x16xf32> to vector<8x16xbf16>
    %cst_103 = arith.constant dense<0.000000e+00> : vector<8x64xf32>
    %284 = tpu.matmul %283, %215, %cst_103 {dimension_numbers = #tpu.dot_dimension_numbers<[1], [0], [0], [1], [0, 0, 1, 1], [], []>} : vector<8x16xbf16>, vector<16x64xbf16>, vector<8x64xf32> -> vector<8x64xf32>
    %285 = arith.addf %282, %284 : vector<8x64xf32>
    %286 = vector.extract_strided_slice %285 {offsets = [0, 0], sizes = [8, 48], strides = [1, 1]} : vector<8x64xf32> to vector<8x48xf32>
    %287 = arith.negf %286 : vector<8x48xf32>
    %288 = math.exp %287 : vector<8x48xf32>
    %cst_104 = arith.constant 1.000000e+00 : f32
    %289 = vector.broadcast %cst_104 : f32 to vector<8x48xf32>
    %290 = arith.addf %289, %288 : vector<8x48xf32>
    %291 = arith.divf %289, %290 : vector<8x48xf32>
    %292 = vector.extract_strided_slice %285 {offsets = [0, 48], sizes = [8, 16], strides = [1, 1]} : vector<8x64xf32> to vector<8x16xf32>
    %293 = math.tanh %292 : vector<8x16xf32>
    %294 = vector.extract_strided_slice %291 {offsets = [0, 0], sizes = [8, 16], strides = [1, 1]} : vector<8x48xf32> to vector<8x16xf32>
    %295 = vector.extract_strided_slice %291 {offsets = [0, 16], sizes = [8, 16], strides = [1, 1]} : vector<8x48xf32> to vector<8x16xf32>
    %296 = vector.extract_strided_slice %291 {offsets = [0, 32], sizes = [8, 16], strides = [1, 1]} : vector<8x48xf32> to vector<8x16xf32>
    %297 = arith.mulf %295, %278 : vector<8x16xf32>
    %298 = arith.mulf %294, %293 : vector<8x16xf32>
    %299 = arith.addf %297, %298 : vector<8x16xf32>
    %300 = math.tanh %299 : vector<8x16xf32>
    %301 = arith.mulf %296, %300 : vector<8x16xf32>
    %c4_105 = arith.constant 4 : index
    %c0_106 = arith.constant 0 : index
    %c0_107 = arith.constant 0 : index
    %302 = vector.load %arg13[%c4_105, %c0_106, %c0_107] : memref<8x8x64xf32, #tpu.memory_space<vmem>>, vector<1x8x64xf32>
    %303 = vector.shape_cast %302 : vector<1x8x64xf32> to vector<8x64xf32>
    %304 = arith.truncf %301 : vector<8x16xf32> to vector<8x16xbf16>
    %cst_108 = arith.constant dense<0.000000e+00> : vector<8x64xf32>
    %305 = tpu.matmul %304, %215, %cst_108 {dimension_numbers = #tpu.dot_dimension_numbers<[1], [0], [0], [1], [0, 0, 1, 1], [], []>} : vector<8x16xbf16>, vector<16x64xbf16>, vector<8x64xf32> -> vector<8x64xf32>
    %306 = arith.addf %303, %305 : vector<8x64xf32>
    %307 = vector.extract_strided_slice %306 {offsets = [0, 0], sizes = [8, 48], strides = [1, 1]} : vector<8x64xf32> to vector<8x48xf32>
    %308 = arith.negf %307 : vector<8x48xf32>
    %309 = math.exp %308 : vector<8x48xf32>
    %cst_109 = arith.constant 1.000000e+00 : f32
    %310 = vector.broadcast %cst_109 : f32 to vector<8x48xf32>
    %311 = arith.addf %310, %309 : vector<8x48xf32>
    %312 = arith.divf %310, %311 : vector<8x48xf32>
    %313 = vector.extract_strided_slice %306 {offsets = [0, 48], sizes = [8, 16], strides = [1, 1]} : vector<8x64xf32> to vector<8x16xf32>
    %314 = math.tanh %313 : vector<8x16xf32>
    %315 = vector.extract_strided_slice %312 {offsets = [0, 0], sizes = [8, 16], strides = [1, 1]} : vector<8x48xf32> to vector<8x16xf32>
    %316 = vector.extract_strided_slice %312 {offsets = [0, 16], sizes = [8, 16], strides = [1, 1]} : vector<8x48xf32> to vector<8x16xf32>
    %317 = vector.extract_strided_slice %312 {offsets = [0, 32], sizes = [8, 16], strides = [1, 1]} : vector<8x48xf32> to vector<8x16xf32>
    %318 = arith.mulf %316, %299 : vector<8x16xf32>
    %319 = arith.mulf %315, %314 : vector<8x16xf32>
    %320 = arith.addf %318, %319 : vector<8x16xf32>
    %321 = math.tanh %320 : vector<8x16xf32>
    %322 = arith.mulf %317, %321 : vector<8x16xf32>
    %c5_110 = arith.constant 5 : index
    %c0_111 = arith.constant 0 : index
    %c0_112 = arith.constant 0 : index
    %323 = vector.load %arg13[%c5_110, %c0_111, %c0_112] : memref<8x8x64xf32, #tpu.memory_space<vmem>>, vector<1x8x64xf32>
    %324 = vector.shape_cast %323 : vector<1x8x64xf32> to vector<8x64xf32>
    %325 = arith.truncf %322 : vector<8x16xf32> to vector<8x16xbf16>
    %cst_113 = arith.constant dense<0.000000e+00> : vector<8x64xf32>
    %326 = tpu.matmul %325, %215, %cst_113 {dimension_numbers = #tpu.dot_dimension_numbers<[1], [0], [0], [1], [0, 0, 1, 1], [], []>} : vector<8x16xbf16>, vector<16x64xbf16>, vector<8x64xf32> -> vector<8x64xf32>
    %327 = arith.addf %324, %326 : vector<8x64xf32>
    %328 = vector.extract_strided_slice %327 {offsets = [0, 0], sizes = [8, 48], strides = [1, 1]} : vector<8x64xf32> to vector<8x48xf32>
    %329 = arith.negf %328 : vector<8x48xf32>
    %330 = math.exp %329 : vector<8x48xf32>
    %cst_114 = arith.constant 1.000000e+00 : f32
    %331 = vector.broadcast %cst_114 : f32 to vector<8x48xf32>
    %332 = arith.addf %331, %330 : vector<8x48xf32>
    %333 = arith.divf %331, %332 : vector<8x48xf32>
    %334 = vector.extract_strided_slice %327 {offsets = [0, 48], sizes = [8, 16], strides = [1, 1]} : vector<8x64xf32> to vector<8x16xf32>
    %335 = math.tanh %334 : vector<8x16xf32>
    %336 = vector.extract_strided_slice %333 {offsets = [0, 0], sizes = [8, 16], strides = [1, 1]} : vector<8x48xf32> to vector<8x16xf32>
    %337 = vector.extract_strided_slice %333 {offsets = [0, 16], sizes = [8, 16], strides = [1, 1]} : vector<8x48xf32> to vector<8x16xf32>
    %338 = vector.extract_strided_slice %333 {offsets = [0, 32], sizes = [8, 16], strides = [1, 1]} : vector<8x48xf32> to vector<8x16xf32>
    %339 = arith.mulf %337, %320 : vector<8x16xf32>
    %340 = arith.mulf %336, %335 : vector<8x16xf32>
    %341 = arith.addf %339, %340 : vector<8x16xf32>
    %342 = math.tanh %341 : vector<8x16xf32>
    %343 = arith.mulf %338, %342 : vector<8x16xf32>
    %c6_115 = arith.constant 6 : index
    %c0_116 = arith.constant 0 : index
    %c0_117 = arith.constant 0 : index
    %344 = vector.load %arg13[%c6_115, %c0_116, %c0_117] : memref<8x8x64xf32, #tpu.memory_space<vmem>>, vector<1x8x64xf32>
    %345 = vector.shape_cast %344 : vector<1x8x64xf32> to vector<8x64xf32>
    %346 = arith.truncf %343 : vector<8x16xf32> to vector<8x16xbf16>
    %cst_118 = arith.constant dense<0.000000e+00> : vector<8x64xf32>
    %347 = tpu.matmul %346, %215, %cst_118 {dimension_numbers = #tpu.dot_dimension_numbers<[1], [0], [0], [1], [0, 0, 1, 1], [], []>} : vector<8x16xbf16>, vector<16x64xbf16>, vector<8x64xf32> -> vector<8x64xf32>
    %348 = arith.addf %345, %347 : vector<8x64xf32>
    %349 = vector.extract_strided_slice %348 {offsets = [0, 0], sizes = [8, 48], strides = [1, 1]} : vector<8x64xf32> to vector<8x48xf32>
    %350 = arith.negf %349 : vector<8x48xf32>
    %351 = math.exp %350 : vector<8x48xf32>
    %cst_119 = arith.constant 1.000000e+00 : f32
    %352 = vector.broadcast %cst_119 : f32 to vector<8x48xf32>
    %353 = arith.addf %352, %351 : vector<8x48xf32>
    %354 = arith.divf %352, %353 : vector<8x48xf32>
    %355 = vector.extract_strided_slice %348 {offsets = [0, 48], sizes = [8, 16], strides = [1, 1]} : vector<8x64xf32> to vector<8x16xf32>
    %356 = math.tanh %355 : vector<8x16xf32>
    %357 = vector.extract_strided_slice %354 {offsets = [0, 0], sizes = [8, 16], strides = [1, 1]} : vector<8x48xf32> to vector<8x16xf32>
    %358 = vector.extract_strided_slice %354 {offsets = [0, 16], sizes = [8, 16], strides = [1, 1]} : vector<8x48xf32> to vector<8x16xf32>
    %359 = vector.extract_strided_slice %354 {offsets = [0, 32], sizes = [8, 16], strides = [1, 1]} : vector<8x48xf32> to vector<8x16xf32>
    %360 = arith.mulf %358, %341 : vector<8x16xf32>
    %361 = arith.mulf %357, %356 : vector<8x16xf32>
    %362 = arith.addf %360, %361 : vector<8x16xf32>
    %363 = math.tanh %362 : vector<8x16xf32>
    %364 = arith.mulf %359, %363 : vector<8x16xf32>
    %c7_120 = arith.constant 7 : index
    %c0_121 = arith.constant 0 : index
    %c0_122 = arith.constant 0 : index
    %365 = vector.load %arg13[%c7_120, %c0_121, %c0_122] : memref<8x8x64xf32, #tpu.memory_space<vmem>>, vector<1x8x64xf32>
    %366 = vector.shape_cast %365 : vector<1x8x64xf32> to vector<8x64xf32>
    %367 = arith.truncf %364 : vector<8x16xf32> to vector<8x16xbf16>
    %cst_123 = arith.constant dense<0.000000e+00> : vector<8x64xf32>
    %368 = tpu.matmul %367, %215, %cst_123 {dimension_numbers = #tpu.dot_dimension_numbers<[1], [0], [0], [1], [0, 0, 1, 1], [], []>} : vector<8x16xbf16>, vector<16x64xbf16>, vector<8x64xf32> -> vector<8x64xf32>
    %369 = arith.addf %366, %368 : vector<8x64xf32>
    %370 = vector.extract_strided_slice %369 {offsets = [0, 0], sizes = [8, 48], strides = [1, 1]} : vector<8x64xf32> to vector<8x48xf32>
    %371 = arith.negf %370 : vector<8x48xf32>
    %372 = math.exp %371 : vector<8x48xf32>
    %cst_124 = arith.constant 1.000000e+00 : f32
    %373 = vector.broadcast %cst_124 : f32 to vector<8x48xf32>
    %374 = arith.addf %373, %372 : vector<8x48xf32>
    %375 = arith.divf %373, %374 : vector<8x48xf32>
    %376 = vector.extract_strided_slice %369 {offsets = [0, 48], sizes = [8, 16], strides = [1, 1]} : vector<8x64xf32> to vector<8x16xf32>
    %377 = math.tanh %376 : vector<8x16xf32>
    %378 = vector.extract_strided_slice %375 {offsets = [0, 0], sizes = [8, 16], strides = [1, 1]} : vector<8x48xf32> to vector<8x16xf32>
    %379 = vector.extract_strided_slice %375 {offsets = [0, 16], sizes = [8, 16], strides = [1, 1]} : vector<8x48xf32> to vector<8x16xf32>
    %380 = vector.extract_strided_slice %375 {offsets = [0, 32], sizes = [8, 16], strides = [1, 1]} : vector<8x48xf32> to vector<8x16xf32>
    %381 = arith.mulf %379, %362 : vector<8x16xf32>
    %382 = arith.mulf %378, %377 : vector<8x16xf32>
    %383 = arith.addf %381, %382 : vector<8x16xf32>
    %384 = math.tanh %383 : vector<8x16xf32>
    %385 = arith.mulf %380, %384 : vector<8x16xf32>
    %c0_125 = arith.constant 0 : index
    %c0_126 = arith.constant 0 : index
    %386 = vector.load %arg8[%c0_125, %c0_126] : memref<1x16xf32, #tpu.memory_space<vmem>>, vector<1x16xf32>
    %387 = vector.broadcast %386 : vector<1x16xf32> to vector<8x16xf32>
    %388 = arith.mulf %385, %387 : vector<8x16xf32>
    %cst_127 = arith.constant dense<0.000000e+00> : vector<8xf32>
    %389 = vector.multi_reduction <add>, %388, %cst_127 [1] : vector<8x16xf32> to vector<8xf32>
    %390 = vector.shape_cast %389 : vector<8xf32> to vector<8x1xf32>
    %c0_128 = arith.constant 0 : index
    %c0_129 = arith.constant 0 : index
    %391 = vector.load %arg9[%c0_128, %c0_129] : memref<1x1xf32, #tpu.memory_space<vmem>>, vector<1x1xf32>
    %392 = vector.broadcast %391 : vector<1x1xf32> to vector<8x1xf32>
    %393 = arith.addf %390, %392 : vector<8x1xf32>
    %c0_130 = arith.constant 0 : index
    %c0_131 = arith.constant 0 : index
    %394 = vector.load %arg10[%c0_130, %c0_131] : memref<8x1xf32, #tpu.memory_space<vmem>>, vector<8x1xf32>
    tpu.vector_store %arg10[%c0_130, %c0_131], %393 {strides = array<i32>} : memref<8x1xf32, #tpu.memory_space<vmem>>, vector<8x1xf32>,
    return
  }
  func.func @transform_0(%arg0: i32) -> (i32, i32, i32) {
    %c0_i32 = arith.constant 0 : i32
    %c0_i32_0 = arith.constant 0 : i32
    %c0_i32_1 = arith.constant 0 : i32
    return %c0_i32, %arg0, %c0_i32_0 : i32, i32, i32
  }
  func.func @transform_1(%arg0: i32) -> (i32, i32) {
    %c0_i32 = arith.constant 0 : i32
    %c0_i32_0 = arith.constant 0 : i32
    %c0_i32_1 = arith.constant 0 : i32
    return %c0_i32, %c0_i32_0 : i32, i32
  }
  func.func @transform_2(%arg0: i32) -> (i32, i32) {
    %c0_i32 = arith.constant 0 : i32
    %c0_i32_0 = arith.constant 0 : i32
    %c0_i32_1 = arith.constant 0 : i32
    return %c0_i32, %c0_i32_0 : i32, i32
  }
  func.func @transform_3(%arg0: i32) -> (i32, i32) {
    %c0_i32 = arith.constant 0 : i32
    %c0_i32_0 = arith.constant 0 : i32
    %c0_i32_1 = arith.constant 0 : i32
    return %c0_i32, %c0_i32_0 : i32, i32
  }
  func.func @transform_4(%arg0: i32) -> (i32, i32) {
    %c0_i32 = arith.constant 0 : i32
    %c0_i32_0 = arith.constant 0 : i32
    %c0_i32_1 = arith.constant 0 : i32
    return %c0_i32, %c0_i32_0 : i32, i32
  }
  func.func @transform_5(%arg0: i32) -> (i32, i32) {
    %c0_i32 = arith.constant 0 : i32
    %c0_i32_0 = arith.constant 0 : i32
    %c0_i32_1 = arith.constant 0 : i32
    return %c0_i32, %c0_i32_0 : i32, i32
  }
  func.func @transform_6(%arg0: i32) -> (i32, i32) {
    %c0_i32 = arith.constant 0 : i32
    %c0_i32_0 = arith.constant 0 : i32
    %c0_i32_1 = arith.constant 0 : i32
    return %c0_i32, %c0_i32_0 : i32, i32
  }
  func.func @transform_7(%arg0: i32) -> (i32, i32) {
    %c0_i32 = arith.constant 0 : i32
    %c0_i32_0 = arith.constant 0 : i32
    %c0_i32_1 = arith.constant 0 : i32
    return %c0_i32, %c0_i32_0 : i32, i32
  }
  func.func @transform_8(%arg0: i32) -> (i32, i32) {
    %c0_i32 = arith.constant 0 : i32
    %c0_i32_0 = arith.constant 0 : i32
    %c0_i32_1 = arith.constant 0 : i32
    return %c0_i32, %c0_i32_0 : i32, i32
  }
  func.func @transform_9(%arg0: i32) -> (i32, i32) {
    %c0_i32 = arith.constant 0 : i32
    %c0_i32_0 = arith.constant 0 : i32
    return %arg0, %c0_i32 : i32, i32
  }
}

</mosaic_0001>

<bundles_post_ra>
// kernel: lstm_model_forward.1
= control target key start
LH: loop header
LB: loop body
LE: loop exit
PB: predicated region body
PF: predicated region fallthrough
CT: control target
= control target key end

     0   :  { %vm68_vm0 = vcmask 1043456   ;;  %v1917_v1 = vmov 0.0   ;;  %vm1918_vm1 = vmmov 0   ;;  %vm55_vm2 = vcmask 64512   ;;  %s1920_s23 = smov 32   ;;  %s1924_s16 = smov 96   ;;  %s2308_s1 = inlined_call_operand.vmem [shape: bf16[8,128], index: 1, kind: input, shape index: {}]   ;;  %s2309_s2 = inlined_call_operand.vmem [shape: bf16[32,128], index: 2, kind: input, shape index: {}]   ;;  %s2310_s0 = inlined_call_operand.vmem [shape: f32[8,8,8], index: 0, kind: input, shape index: {}]   ;;  %s2311_s3 = inlined_call_operand.vmem [shape: f32[1,128], index: 3, kind: input, shape index: {}]   ;;  %s2312_s4 = inlined_call_operand.vmem [shape: bf16[32,64], index: 4, kind: input, shape index: {}]   ;;  %s2313_s5 = inlined_call_operand.vmem [shape: bf16[16,64], index: 5, kind: input, shape index: {}]   ;;  %s2314_s6 = inlined_call_operand.vmem [shape: f32[1,64], index: 6, kind: input, shape index: {}]   ;;  %s2315_s7 = inlined_call_operand.vmem [shape: f32[1,16], index: 7, kind: input, shape index: {}]   ;;  %s2316_s8 = inlined_call_operand.<no memory space> [shape: f32[1,1], index: 8, kind: input, shape index: {}]   ;;  %s2317_s9 = inlined_call_operand.vmem [shape: f32[8,1], index: 9, kind: output, shape index: {}]  }
   0x1   :  { %v47_v0 = vld [vmem:[%s2308_s1] sm:$0xf]  ;;  %1651 = vmatprep.subr.bf16.mxu1 %v1917_v1  ;;  %1655 = vmatprep.mubr.msk.bf16.mxu1 %vm1918_vm1, %v1917_v1  ;;  %v1984_v3 = vld [vmem:[%s2309_s2 + $0x8] sm:$0xff]   ;;  %v37_v7 = vld [vmem:[%s2310_s0 + $0x10] sm:$0xff]  ;;  %v1919_v11 = vmov 0   ;;  %vm162_vm3 = vcmask 261120  }
   0x2   :  { %1775 = vmatprep.subr.msk.bf16.mxu0 %vm68_vm0, %v47_v0  ;;  %v70_v2 = vsel %vm68_vm0, %v47_v0, 0  ;;  %v35_v4 = vld [vmem:[%s2310_s0] sm:$0xff]  ;;  %v36_v5 = vld [vmem:[%s2310_s0 + $0x8] sm:$0xff]  ;;  %v38_v8 = vld [vmem:[%s2310_s0 + $0x18] sm:$0xff]  ;;  %1652 = vmatpush3.bf16.msra.mxu1 %v1984_v3  ;;  %vm908_vm4 = vcmask 523264   ;;  %s1923_s1 = smov 16  }
   0x3   :  { %1642 = vmatpush3.bf16.msra.mxu0 %v70_v2  ;;  %v43_v6 = vpack.c.bf16 %v36_v5, %v35_v4  ;;  %v44_v9 = vpack.c.bf16 %v38_v8, %v37_v7  ;;  %v2002_v10 = vld [vmem:[%s2309_s2] sm:$0xff]   ;;  %1653 = vmatprep.subr.bf16.mxu1 %v1917_v1  ;;  %v40_v55 = vld [vmem:[%s2310_s0 + $0x28] sm:$0xff]  ;;  %v41_v56 = vld [vmem:[%s2310_s0 + $0x30] sm:$0xff]  ;;  %vm926_vm5 = vcmask 130048   ;;  %vm1537_vm6 = vcmask 7168  }
   0x4   :  { %1667 = vmatprep.subr.bf16.mxu0 %v1917_v1  ;;  %v2026_v13 = vld [vmem:[%s2311_s3] ss:$0 sm:$0xff]  ;;  %s1921_s3 = smov 64   ;;  %v42_v58 = vld [vmem:[%s2310_s0 + $0x38] sm:$0xff] }
   0x5   :  { %1643 = vmatprep.mubr.msk.bf16.mxu0 %vm55_vm2, %v43_v6  ;;  %v39_v54 = vld [vmem:[%s2310_s0 + $0x20] sm:$0xff]  ;;  %v46_v59 = vpack.c.bf16 %v42_v58, %v41_v56 }
   0x6   :  { %1644 = vmatmul.mubr.msk.bf16.vlgmr.msra.gmra.mxu0 %vm55_vm2, %v44_v9  ;;  %1654 = vmatpush3.bf16.msra.mxu1 %v2002_v10  ;;  %v45_v57 = vpack.c.bf16 %v40_v55, %v39_v54 }
   0x7   :  { %1668 = vmatpush3.bf16.msra.mxu0 %v1984_v3  ;;  %1659 = vmatprep.subr.bf16.mxu1 %v1917_v1 }
   0x8   :  { %1669 = vmatprep.subr.bf16.mxu0 %v1917_v1  ;;  %1647 = vmatprep.mubr.msk.bf16.mxu0 %vm55_vm2, %v45_v57 }
   0x9   :  { %1656 = vmatmul.mubr.bf16.vlgmr.msra.gmra.mxu1 %v1919_v11 }
   0xa   :  { %1660 = vmatpush3.bf16.msra.mxu1 %v1984_v3  ;;  %1663 = vmatprep.mubr.msk.bf16.mxu1 %vm1918_vm1, %v1917_v1 }
   0xb   :  { %1670 = vmatpush3.bf16.msra.mxu0 %v2002_v10  ;;  %1661 = vmatprep.subr.bf16.mxu1 %v1917_v1 }
   0xc   :  { %1683 = vmatprep.subr.bf16.mxu0 %v1917_v1 }
   0xe   :  { %1662 = vmatpush3.bf16.msra.mxu1 %v2002_v10  ;;  %1648 = vmatmul.mubr.msk.bf16.gmra.mxu0 %vm55_vm2, %v46_v59 }
   0xf   :  { %1675 = vmatprep.subr.bf16.mxu1 %v1917_v1  ;;  %1671 = vmatprep.mubr.msk.bf16.mxu0 %vm1918_vm1, %v1917_v1 }
  0xc6   :  { %v2021_v12 = vpop.f32.mrf.mxu0 }
  0xc7   :  { %v115_v7 = vadd.f32 %v2021_v12, %v2026_v13 }
  0xc8   :  { %v106_v14 = vpop.f32.mrf.mxu0 }
  0xc9   :  { %v107_v15 = vadd.f32 %v2026_v13, %v106_v14  ;;  %v200_v16 = vpop.f32.mrf.mxu1 }
  0xca   :  { %v2044_v36 = vpop.f32.mrf.mxu0 }
  0xcb   :  { %v206_v17 = vadd.f32 %v200_v16, %v107_v15  ;;  %v1657_v18 = vpop.f32.mrf.mxu1 }
  0xcc   :  { %v109_v37 = vpop.f32.mrf.mxu0 }
  0xcd   :  { %1789 = vtanh.f32 %v206_v17  ;;  %v203_v19 = vpop.f32.mrf.mxu1  ;;  %v1550_v22 = vmul.f32 -1.442695, %v206_v17  ;;  %v110_v38 = vadd.f32 %v2026_v13, %v109_v37 }
  0xce   :  { %v2078_v2 = vpop.f32.mrf.mxu0 }
  0xcf   :  { %v1658_v20 = vpop.f32.mrf.mxu1  ;;  %1791 = vpow2.f32 %v1550_v22 }
  0xd0   :  { %v2080_v4 = vpop.f32.mrf.mxu0 }
  0xd2   :  { %v2082_v5 = vpop.f32.mrf.mxu0 }
  0xd4   :  { %v2084_v6 = vpop.f32.mrf.mxu0 }
  0xda   :  { %v1790_v21 = vpop.eup %1789 }
  0xdb   :  { %216 = vrot.lane.b32.xlu0 %v1790_v21, %s1920_s23 }
  0xdc   :  { %v1792_v23 = vpop.eup %1791 }
  0xdd   :  { %v210_v24 = vadd.f32 1.0, %v1792_v23 }
  0xdf   :  { %1793 = vrcp.f32 %v210_v24 }
  0xec   :  { %v1794_v25 = vpop.eup %1793 }
  0xed   :  { %v214_v28 = vmul.f32 0.0, %v1794_v25 }
 0x14d   :  { %v217_v26 = vpop.permute.xlu0 %216 }
 0x14e   :  { %v219_v27 = vmul.f32 %v1794_v25, %v217_v26 }
 0x150   :  { %221 = vrot.lane.b32.xlu0 %v219_v27, %s1920_s23 }
 0x1c2   :  { %v222_v29 = vpop.permute.xlu0 %221 }
 0x1c3   :  { %v224_v30 = vadd.f32 %v222_v29, %v214_v28 }
 0x1c5   :  { %1795 = vtanh.f32 %v224_v30 }
 0x1d2   :  { %v1796_v31 = vpop.eup %1795 }
 0x1d3   :  { %227 = vrot.lane.b32.xlu1 %v1796_v31, %s1920_s23  ;;  %v118_v31 = vadd.f32 %v2044_v36, %v2026_v13 }
 0x245   :  { %v228_v32 = vpop.permute.xlu1 %227 }
 0x246   :  { %v2032_v33 = vmul.f32 %v1794_v25, %v228_v32 }
 0x248   :  { %v238_v34 = vpack.c.bf16 %v2032_v33, %v2032_v33 }
 0x24a   :  { %240 = vrot.lane.b32.xlu1 %v238_v34, %s1921_s3 }
 0x2bc   :  { %v241_v35 = vpop.permute.xlu1 %240 }
 0x2bd   :  { %1664 = vmatmul.mubr.msk.bf16.vlgmr.msra.gmra.mxu1 %vm162_vm3, %v241_v35 }
 0x2be   :  { %1676 = vmatpush3.bf16.msra.mxu1 %v1984_v3  ;;  %1679 = vmatprep.mubr.msk.bf16.mxu1 %vm1918_vm1, %v1917_v1 }
 0x2bf   :  { %1677 = vmatprep.subr.bf16.mxu1 %v1917_v1 }
 0x2c2   :  { %1678 = vmatpush3.bf16.msra.mxu1 %v2002_v10 }
 0x2c3   :  { %1691 = vmatprep.subr.bf16.mxu1 %v1917_v1 }
 0x37d   :  { %v279_v39 = vpop.f32.mrf.mxu1 }
 0x37e   :  { %v285_v40 = vadd.f32 %v279_v39, %v110_v38 }
 0x37f   :  { %v1665_v41 = vpop.f32.mrf.mxu1 }
 0x380   :  { %1797 = vtanh.f32 %v285_v40  ;;  %v1552_v45 = vmul.f32 -1.442695, %v285_v40 }
 0x381   :  { %v282_v42 = vpop.f32.mrf.mxu1 }
 0x382   :  { %1799 = vpow2.f32 %v1552_v45 }
 0x383   :  { %v1666_v43 = vpop.f32.mrf.mxu1 }
 0x38d   :  { %v1798_v44 = vpop.eup %1797 }
 0x38e   :  { %295 = vrot.lane.b32.xlu0 %v1798_v44, %s1920_s23 }
 0x38f   :  { %v1800_v46 = vpop.eup %1799 }
 0x390   :  { %v289_v47 = vadd.f32 1.0, %v1800_v46 }
 0x392   :  { %1801 = vrcp.f32 %v289_v47 }
 0x39f   :  { %v1802_v48 = vpop.eup %1801 }
 0x3a0   :  { %v293_v51 = vmul.f32 %v1802_v48, %v224_v30 }
 0x400   :  { %v296_v49 = vpop.permute.xlu0 %295 }
 0x401   :  { %v298_v50 = vmul.f32 %v1802_v48, %v296_v49 }
 0x403   :  { %300 = vrot.lane.b32.xlu1 %v298_v50, %s1920_s23 }
 0x475   :  { %v301_v52 = vpop.permute.xlu1 %300 }
 0x476   :  { %v303_v53 = vadd.f32 %v301_v52, %v293_v51 }
 0x478   :  { %1803 = vtanh.f32 %v303_v53 }
 0x485   :  { %v1804_v60 = vpop.eup %1803 }
 0x486   :  { %306 = vrot.lane.b32.xlu0 %v1804_v60, %s1920_s23 }
 0x4f8   :  { %v307_v61 = vpop.permute.xlu0 %306 }
 0x4f9   :  { %v2066_v62 = vmul.f32 %v1802_v48, %v307_v61 }
 0x4fb   :  { %v318_v63 = vpack.c.bf16 %v2066_v62, %v2066_v62 }
 0x4fd   :  { %320 = vrot.lane.b32.xlu1 %v318_v63, %s1921_s3 }
 0x56f   :  { %v321_v0 = vpop.permute.xlu1 %320 }
 0x570   :  { %1672 = vmatmul.mubr.msk.bf16.vlgmr.msra.gmra.mxu0 %vm162_vm3, %v321_v0 }
 0x571   :  { %1684 = vmatpush3.bf16.msra.mxu0 %v1984_v3  ;;  %1687 = vmatprep.mubr.msk.bf16.mxu0 %vm1918_vm1, %v1917_v1 }
 0x572   :  { %1685 = vmatprep.subr.bf16.mxu0 %v1917_v1 }
 0x575   :  { %1686 = vmatpush3.bf16.msra.mxu0 %v2002_v10 }
 0x576   :  { %1699 = vmatprep.subr.bf16.mxu0 %v1917_v1 }
 0x630   :  { %v359_v8 = vpop.f32.mrf.mxu0 }
 0x631   :  { %v365_v9 = vadd.f32 %v359_v8, %v115_v7 }
 0x632   :  { %v1673_v14 = vpop.f32.mrf.mxu0 }
 0x633   :  { %1805 = vtanh.f32 %v365_v9  ;;  %v1554_v18 = vmul.f32 -1.442695, %v365_v9 }
 0x634   :  { %v362_v15 = vpop.f32.mrf.mxu0 }
 0x635   :  { %1807 = vpow2.f32 %v1554_v18 }
 0x636   :  { %v1674_v16 = vpop.f32.mrf.mxu0 }
 0x640   :  { %v1806_v17 = vpop.eup %1805 }
 0x641   :  { %375 = vrot.lane.b32.xlu0 %v1806_v17, %s1920_s23 }
 0x642   :  { %v1808_v19 = vpop.eup %1807 }
 0x643   :  { %v369_v20 = vadd.f32 1.0, %v1808_v19 }
 0x645   :  { %1809 = vrcp.f32 %v369_v20  ;;  %v126_v20 = vadd.f32 %v2026_v13, %v2084_v6 }
 0x652   :  { %v1810_v21 = vpop.eup %1809 }
 0x653   :  { %v373_v12 = vmul.f32 %v1810_v21, %v303_v53  ;;  %v123_v53 = vadd.f32 %v2026_v13, %v2080_v4 }
 0x6b3   :  { %v376_v22 = vpop.permute.xlu0 %375 }
 0x6b4   :  { %v378_v23 = vmul.f32 %v1810_v21, %v376_v22 }
 0x6b6   :  { %380 = vrot.lane.b32.xlu1 %v378_v23, %s1920_s23 }
 0x728   :  { %v381_v24 = vpop.permute.xlu1 %380 }
 0x729   :  { %v383_v25 = vadd.f32 %v381_v24, %v373_v12 }
 0x72b   :  { %1811 = vtanh.f32 %v383_v25 }
 0x738   :  { %v1812_v26 = vpop.eup %1811 }
 0x739   :  { %386 = vrot.lane.b32.xlu0 %v1812_v26, %s1920_s23 }
 0x7ab   :  { %v387_v27 = vpop.permute.xlu0 %386 }
 0x7ac   :  { %v2091_v28 = vmul.f32 %v1810_v21, %v387_v27 }
 0x7ae   :  { %v398_v29 = vpack.c.bf16 %v2091_v28, %v2091_v28 }
 0x7b0   :  { %400 = vrot.lane.b32.xlu1 %v398_v29, %s1921_s3 }
 0x822   :  { %v401_v30 = vpop.permute.xlu1 %400 }
 0x823   :  { %1680 = vmatmul.mubr.msk.bf16.vlgmr.msra.gmra.mxu1 %vm162_vm3, %v401_v30 }
 0x824   :  { %1692 = vmatpush3.bf16.msra.mxu1 %v1984_v3  ;;  %1695 = vmatprep.mubr.msk.bf16.mxu1 %vm1918_vm1, %v1917_v1 }
 0x825   :  { %1693 = vmatprep.subr.bf16.mxu1 %v1917_v1 }
 0x828   :  { %1694 = vmatpush3.bf16.msra.mxu1 %v2002_v10 }
 0x829   :  { %1707 = vmatprep.subr.bf16.mxu1 %v1917_v1 }
 0x8e3   :  { %v439_v32 = vpop.f32.mrf.mxu1 }
 0x8e4   :  { %v445_v34 = vadd.f32 %v439_v32, %v118_v31 }
 0x8e5   :  { %v1681_v35 = vpop.f32.mrf.mxu1 }
 0x8e6   :  { %1813 = vtanh.f32 %v445_v34  ;;  %v1556_v40 = vmul.f32 -1.442695, %v445_v34 }
 0x8e7   :  { %v442_v37 = vpop.f32.mrf.mxu1 }
 0x8e8   :  { %1815 = vpow2.f32 %v1556_v40  ;;  %v131_v40 = vadd.f32 %v2078_v2, %v2026_v13 }
 0x8e9   :  { %v1682_v38 = vpop.f32.mrf.mxu1 }
 0x8f3   :  { %v1814_v39 = vpop.eup %1813 }
 0x8f4   :  { %455 = vrot.lane.b32.xlu0 %v1814_v39, %s1920_s23 }
 0x8f5   :  { %v1816_v41 = vpop.eup %1815 }
 0x8f6   :  { %v449_v42 = vadd.f32 1.0, %v1816_v41 }
 0x8f8   :  { %1817 = vrcp.f32 %v449_v42 }
 0x905   :  { %v1818_v43 = vpop.eup %1817 }
 0x906   :  { %v453_v36 = vmul.f32 %v1818_v43, %v383_v25 }
 0x966   :  { %v456_v44 = vpop.permute.xlu0 %455 }
 0x967   :  { %v458_v45 = vmul.f32 %v1818_v43, %v456_v44 }
 0x969   :  { %460 = vrot.lane.b32.xlu1 %v458_v45, %s1920_s23 }
 0x9db   :  { %v461_v46 = vpop.permute.xlu1 %460 }
 0x9dc   :  { %v463_v47 = vadd.f32 %v461_v46, %v453_v36 }
 0x9de   :  { %1819 = vtanh.f32 %v463_v47 }
 0x9eb   :  { %v1820_v48 = vpop.eup %1819 }
 0x9ec   :  { %466 = vrot.lane.b32.xlu0 %v1820_v48, %s1920_s23 }
 0xa5e   :  { %v467_v49 = vpop.permute.xlu0 %466 }
 0xa5f   :  { %v2108_v50 = vmul.f32 %v1818_v43, %v467_v49 }
 0xa61   :  { %v478_v51 = vpack.c.bf16 %v2108_v50, %v2108_v50 }
 0xa63   :  { %480 = vrot.lane.b32.xlu1 %v478_v51, %s1921_s3 }
 0xad5   :  { %v481_v52 = vpop.permute.xlu1 %480 }
 0xad6   :  { %1688 = vmatmul.mubr.msk.bf16.vlgmr.msra.gmra.mxu0 %vm162_vm3, %v481_v52 }
 0xad7   :  { %1700 = vmatpush3.bf16.msra.mxu0 %v1984_v3  ;;  %1703 = vmatprep.mubr.msk.bf16.mxu0 %vm1918_vm1, %v1917_v1 }
 0xad8   :  { %1701 = vmatprep.subr.bf16.mxu0 %v1917_v1 }
 0xadb   :  { %1702 = vmatpush3.bf16.msra.mxu0 %v2002_v10 }
 0xb96   :  { %v519_v54 = vpop.f32.mrf.mxu0 }
 0xb97   :  { %v525_v55 = vadd.f32 %v519_v54, %v123_v53 }
 0xb98   :  { %v1689_v56 = vpop.f32.mrf.mxu0 }
 0xb99   :  { %1821 = vtanh.f32 %v525_v55  ;;  %v1558_v60 = vmul.f32 -1.442695, %v525_v55 }
 0xb9a   :  { %v522_v57 = vpop.f32.mrf.mxu0 }
 0xb9b   :  { %1823 = vpow2.f32 %v1558_v60  ;;  %v1786_v57 = vld [vmem:[%s2312_s4 + $0x8] sm:$0xff]  }
 0xb9c   :  { %v1690_v58 = vpop.f32.mrf.mxu0  ;;  %1715 = vmatprep.subr.bf16.mxu0 %v1786_v57 }
 0xba6   :  { %v1822_v59 = vpop.eup %1821 }
 0xba7   :  { %535 = vrot.lane.b32.xlu0 %v1822_v59, %s1920_s23 }
 0xba8   :  { %v1824_v61 = vpop.eup %1823 }
 0xba9   :  { %v529_v63 = vadd.f32 1.0, %v1824_v61 }
 0xbab   :  { %1825 = vrcp.f32 %v529_v63 }
 0xbb8   :  { %v1826_v0 = vpop.eup %1825 }
 0xbb9   :  { %v533_v4 = vmul.f32 %v1826_v0, %v463_v47 }
 0xc19   :  { %v536_v7 = vpop.permute.xlu0 %535 }
 0xc1a   :  { %v538_v8 = vmul.f32 %v1826_v0, %v536_v7 }
 0xc1c   :  { %540 = vrot.lane.b32.xlu1 %v538_v8, %s1920_s23 }
 0xc8e   :  { %v541_v9 = vpop.permute.xlu1 %540 }
 0xc8f   :  { %v543_v14 = vadd.f32 %v541_v9, %v533_v4  ;;  %v2183_v9 = vld [vmem:[%s2313_s5] sm:$0xff]  }
 0xc91   :  { %1827 = vtanh.f32 %v543_v14 }
 0xc9e   :  { %v1828_v15 = vpop.eup %1827 }
 0xc9f   :  { %546 = vrot.lane.b32.xlu0 %v1828_v15, %s1920_s23  ;;  %v2201_v15 = vld [vmem:[%s2314_s6] ss:$0 sm:$0xff]  ;;  %s1922_s6 = smov 80  }
 0xd11   :  { %v547_v16 = vpop.permute.xlu0 %546 }
 0xd12   :  { %v2124_v17 = vmul.f32 %v1826_v0, %v547_v16 }
 0xd14   :  { %v558_v18 = vpack.c.bf16 %v2124_v17, %v2124_v17 }
 0xd16   :  { %560 = vrot.lane.b32.xlu1 %v558_v18, %s1921_s3 }
 0xd88   :  { %v561_v19 = vpop.permute.xlu1 %560 }
 0xd89   :  { %1696 = vmatmul.mubr.msk.bf16.vlgmr.msra.gmra.mxu1 %vm162_vm3, %v561_v19 }
 0xd8a   :  { %1708 = vmatpush3.bf16.msra.mxu1 %v1984_v3  ;;  %1711 = vmatprep.mubr.msk.bf16.mxu1 %vm1918_vm1, %v1917_v1 }
 0xd8b   :  { %1709 = vmatprep.subr.bf16.mxu1 %v1917_v1 }
 0xd8e   :  { %1710 = vmatpush3.bf16.msra.mxu1 %v2002_v10 }
 0xd8f   :  { %1727 = vmatprep.subr.bf16.mxu1 %v1917_v1 }
 0xe49   :  { %v599_v21 = vpop.f32.mrf.mxu1 }
 0xe4a   :  { %v605_v22 = vadd.f32 %v599_v21, %v126_v20 }
 0xe4b   :  { %v1697_v23 = vpop.f32.mrf.mxu1 }
 0xe4c   :  { %1829 = vtanh.f32 %v605_v22  ;;  %v1560_v3 = vmul.f32 -1.442695, %v605_v22 }
 0xe4d   :  { %v602_v12 = vpop.f32.mrf.mxu1 }
 0xe4e   :  { %1831 = vpow2.f32 %v1560_v3  ;;  %v134_v12 = vadd.f32 %v2082_v5, %v2026_v13 }
 0xe4f   :  { %v1698_v24 = vpop.f32.mrf.mxu1 }
 0xe59   :  { %v1830_v25 = vpop.eup %1829 }
 0xe5a   :  { %615 = vrot.lane.b32.xlu0 %v1830_v25, %s1920_s23 }
 0xe5b   :  { %v1832_v26 = vpop.eup %1831 }
 0xe5c   :  { %v609_v27 = vadd.f32 1.0, %v1832_v26 }
 0xe5e   :  { %1833 = vrcp.f32 %v609_v27 }
 0xe6b   :  { %v1834_v10 = vpop.eup %1833 }
 0xe6c   :  { %v613_v6 = vmul.f32 %v1834_v10, %v543_v14 }
 0xecc   :  { %v616_v29 = vpop.permute.xlu0 %615 }
 0xecd   :  { %v618_v30 = vmul.f32 %v1834_v10, %v616_v29 }
 0xecf   :  { %620 = vrot.lane.b32.xlu1 %v618_v30, %s1920_s23 }
 0xf41   :  { %v621_v31 = vpop.permute.xlu1 %620 }
 0xf42   :  { %v623_v32 = vadd.f32 %v621_v31, %v613_v6 }
 0xf44   :  { %1835 = vtanh.f32 %v623_v32 }
 0xf51   :  { %v1836_v34 = vpop.eup %1835 }
 0xf52   :  { %626 = vrot.lane.b32.xlu0 %v1836_v34, %s1920_s23 }
 0xfc4   :  { %v627_v35 = vpop.permute.xlu0 %626 }
 0xfc5   :  { %v2141_v37 = vmul.f32 %v1834_v10, %v627_v35 }
 0xfc7   :  { %v638_v38 = vpack.c.bf16 %v2141_v37, %v2141_v37 }
 0xfc9   :  { %640 = vrot.lane.b32.xlu1 %v638_v38, %s1921_s3 }
0x103b   :  { %v641_v39 = vpop.permute.xlu1 %640 }
0x103c   :  { %1704 = vmatmul.mubr.msk.bf16.vlgmr.msra.gmra.mxu0 %vm162_vm3, %v641_v39 }
0x103d   :  { %1716 = vmatpush3.bf16.msra.mxu0 %v1786_v57 }
0x10fc   :  { %v679_v41 = vpop.f32.mrf.mxu0 }
0x10fd   :  { %v685_v42 = vadd.f32 %v679_v41, %v131_v40 }
0x10fe   :  { %v1705_v43 = vpop.f32.mrf.mxu0 }
0x10ff   :  { %1837 = vtanh.f32 %v685_v42  ;;  %v1562_v46 = vmul.f32 -1.442695, %v685_v42 }
0x1100   :  { %v682_v44 = vpop.f32.mrf.mxu0 }
0x1101   :  { %1839 = vpow2.f32 %v1562_v46 }
0x1102   :  { %v1706_v45 = vpop.f32.mrf.mxu0 }
0x110c   :  { %v1838_v36 = vpop.eup %1837 }
0x110d   :  { %695 = vrot.lane.b32.xlu0 %v1838_v36, %s1920_s23 }
0x110e   :  { %v1840_v47 = vpop.eup %1839 }
0x110f   :  { %v689_v48 = vadd.f32 1.0, %v1840_v47 }
0x1111   :  { %1841 = vrcp.f32 %v689_v48 }
0x111e   :  { %v1842_v49 = vpop.eup %1841 }
0x111f   :  { %v693_v2 = vmul.f32 %v1842_v49, %v623_v32 }
0x117f   :  { %v696_v51 = vpop.permute.xlu0 %695 }
0x1180   :  { %v698_v52 = vmul.f32 %v1842_v49, %v696_v51 }
0x1182   :  { %700 = vrot.lane.b32.xlu1 %v698_v52, %s1920_s23 }
0x1186   :  { %232 = vrot.lane.b32.xlu1 %v2032_v33, %s1921_s3  ;;  %v1787_v33 = vld [vmem:[%s2312_s4] sm:$0xff]  }
0x1187   :  { %1717 = vmatprep.subr.bf16.mxu0 %v1787_v33 }
0x1188   :  { %1718 = vmatpush3.bf16.msra.mxu0 %v1787_v33 }
0x1189   :  { %1739 = vmatprep.subr.bf16.mxu0 %v1917_v1 }
0x118a   :  { %391 = vrot.lane.b32.xlu1 %v2091_v28, %s1921_s3 }
0x11f4   :  { %v701_v53 = vpop.permute.xlu1 %700 }
0x11f5   :  { %v2155_v54 = vadd.f32 %v701_v53, %v693_v2 }
0x11f7   :  { %1843 = vtanh.f32 %v2155_v54 }
0x11f8   :  { %v233_v55 = vpop.permute.xlu1 %232 }
0x11f9   :  { %235 = vst.msk [vmem:[#allocation3] sm:$0xff] %vm162_vm3, %v233_v55 }
0x11fc   :  { %v392_v56 = vpop.permute.xlu1 %391 }
0x11fd   :  { %395 = vst.msk [vmem:[#allocation3 + $0x10] sm:$0xff] %vm162_vm3, %v392_v56 }
0x1200   :  { %v796_v0 = vld [vmem:[#allocation3] sm:$0xff] }
0x1204   :  { %v1844_v28 = vpop.eup %1843 }
0x1205   :  { %706 = vrot.lane.b32.xlu0 %v1844_v28, %s1920_s23 }
0x1209   :  { %311 = vrot.lane.b32.xlu0 %v2066_v62, %s1921_s3 }
0x120d   :  { %471 = vrot.lane.b32.xlu0 %v2108_v50, %s1921_s3  ;;  %v798_v50 = vld [vmem:[#allocation3 + $0x10] sm:$0xff] }
0x1277   :  { %v707_v58 = vpop.permute.xlu0 %706 }
0x1278   :  { %v2172_v59 = vmul.f32 %v1842_v49, %v707_v58 }
0x127a   :  { %v718_v60 = vpack.c.bf16 %v2172_v59, %v2172_v59 }
0x127b   :  { %v312_v61 = vpop.permute.xlu0 %311 }
0x127c   :  { %315 = vst.msk [vmem:[#allocation3 + $0x8] sm:$0xff] %vm162_vm3, %v312_v61  ;;  %720 = vrot.lane.b32.xlu1 %v718_v60, %s1921_s3 }
0x127f   :  { %v472_v63 = vpop.permute.xlu0 %471 }
0x1280   :  { %475 = vst.msk [vmem:[#allocation3 + $0x18] sm:$0xff] %vm162_vm3, %v472_v63 }
0x1283   :  { %v797_v7 = vld [vmem:[#allocation3 + $0x8] sm:$0xff] }
0x1284   :  { %v804_v62 = vpack.c.bf16 %v797_v7, %v796_v0 }
0x1286   :  { %1719 = vmatprep.mubr.msk.bf16.mxu0 %vm162_vm3, %v804_v62 }
0x1287   :  { %v799_v8 = vld [vmem:[#allocation3 + $0x18] sm:$0xff] }
0x1288   :  { %v805_v4 = vpack.c.bf16 %v799_v8, %v798_v50 }
0x128a   :  { %1720 = vmatmul.mubr.msk.bf16.vlgmr.msra.gmra.mxu0 %vm162_vm3, %v805_v4 }
0x128b   :  { %1740 = vmatpush3.bf16.msra.mxu0 %v2183_v9 }
0x128c   :  { %1751 = vmatprep.subr.bf16.mxu0 %v1917_v1 }
0x12ee   :  { %v721_v14 = vpop.permute.xlu1 %720 }
0x12ef   :  { %1712 = vmatmul.mubr.msk.bf16.vlgmr.msra.gmra.mxu1 %vm162_vm3, %v721_v14 }
0x12f0   :  { %1728 = vmatpush3.bf16.msra.mxu1 %v2183_v9  ;;  %1729 = vmatprep.mubr.msk.bf16.mxu1 %vm1918_vm1, %v1917_v1 }
0x12f1   :  { %1733 = vmatprep.subr.bf16.mxu1 %v1917_v1 }
0x12f7   :  { %1730 = vmatmul.mubr.bf16.vlgmr.msra.gmra.mxu1 %v1919_v11 }
0x12f8   :  { %1734 = vmatpush3.bf16.msra.mxu1 %v2183_v9  ;;  %1735 = vmatprep.mubr.msk.bf16.mxu1 %vm1918_vm1, %v1917_v1 }
0x12f9   :  { %1745 = vmatprep.subr.bf16.mxu1 %v1917_v1 }
0x134a   :  { %v1721_v16 = vpop.f32.mrf.mxu0 }
0x134b   :  { %v886_v18 = vadd.f32 %v1721_v16, %v2201_v15 }
0x134c   :  { %v877_v19 = vpop.f32.mrf.mxu0 }
0x134d   :  { %911 = vst.msk [vmem:[#allocation4 + $0x10] sm:$0xff] %vm908_vm4, %v886_v18  ;;  %v878_v11 = vadd.f32 %v2201_v15, %v877_v19 }
0x134e   :  { %v1722_v20 = vpop.f32.mrf.mxu0 }
0x134f   :  { %909 = vst.msk [vmem:[#allocation4] sm:$0xff] %vm908_vm4, %v878_v11  ;;  %v889_v21 = vadd.f32 %v1722_v20, %v2201_v15 }
0x1350   :  { %v880_v22 = vpop.f32.mrf.mxu0 }
0x1351   :  { %912 = vst.msk [vmem:[#allocation4 + $0x18] sm:$0xff] %vm908_vm4, %v889_v21  ;;  %v881_v23 = vadd.f32 %v2201_v15, %v880_v22 }
0x1353   :  { %910 = vst.msk [vmem:[#allocation4 + $0x8] sm:$0xff] %vm908_vm4, %v881_v23 }
0x1356   :  { %v919_v10 = vld [vmem:[#allocation4] sm:$0xff] }
0x135a   :  { %v995_v61 = vld [vmem:[#allocation4 + $0x8] sm:$0xff] }
0x13af   :  { %v759_v24 = vpop.f32.mrf.mxu1 }
0x13b0   :  { %v765_v25 = vadd.f32 %v759_v24, %v134_v12 }
0x13b1   :  { %v1713_v3 = vpop.f32.mrf.mxu1 }
0x13b2   :  { %v1564_v36 = vmul.f32 -1.442695, %v765_v25 }
0x13b3   :  { %v762_v26 = vpop.f32.mrf.mxu1 }
0x13b5   :  { %v1714_v27 = vpop.f32.mrf.mxu1 }
0x13b7   :  { %v963_v29 = vpop.f32.mrf.mxu1 }
0x13b8   :  { %v969_v30 = vadd.f32 %v963_v29, %v919_v10 }
0x13b9   :  { %v1731_v6 = vpop.f32.mrf.mxu1 }
0x13ba   :  { %1845 = vtanh.f32 %v969_v30  ;;  %v1573_v35 = vmul.f32 -1.442695, %v969_v30 }
0x13bb   :  { %v966_v31 = vpop.f32.mrf.mxu1 }
0x13bc   :  { %1847 = vpow2.f32 %v1573_v35 }
0x13bd   :  { %v1732_v32 = vpop.f32.mrf.mxu1 }
0x13c7   :  { %v1846_v34 = vpop.eup %1845 }
0x13c8   :  { %979 = vrot.lane.b32.xlu0 %v1846_v34, %s1922_s6 }
0x13c9   :  { %v1848_v38 = vpop.eup %1847 }
0x13ca   :  { %v973_v13 = vadd.f32 1.0, %v1848_v38 }
0x13cc   :  { %1849 = vrcp.f32 %v973_v13 }
0x13d9   :  { %v1850_v5 = vpop.eup %1849 }
0x13da   :  { %v977_v41 = vmul.f32 0.0, %v1850_v5 }
0x143a   :  { %v980_v39 = vpop.permute.xlu0 %979 }
0x143b   :  { %v982_v40 = vmul.f32 %v1850_v5, %v980_v39 }
0x143d   :  { %984 = vrot.lane.b32.xlu1 %v982_v40, %s1923_s1  ;;  %v1069_v40 = vld [vmem:[#allocation4 + $0x10] sm:$0xff] }
0x14af   :  { %v985_v42 = vpop.permute.xlu1 %984 }
0x14b0   :  { %v987_v43 = vadd.f32 %v985_v42, %v977_v41 }
0x14b2   :  { %1851 = vtanh.f32 %v987_v43 }
0x14b3   :  { %1853 = vtanh.f32 %v765_v25 }
0x14b4   :  { %1855 = vpow2.f32 %v1564_v36 }
0x14bf   :  { %v1852_v44 = vpop.eup %1851 }
0x14c0   :  { %990 = vrot.lane.b32.xlu0 %v1852_v44, %s1923_s1  ;;  %v1854_v45 = vpop.eup %1853 }
0x14c1   :  { %v1856_v46 = vpop.eup %1855 }
0x14c2   :  { %v769_v47 = vadd.f32 1.0, %v1856_v46 }
0x14c4   :  { %775 = vrot.lane.b32.xlu0 %v1854_v45, %s1920_s23  ;;  %1857 = vrcp.f32 %v769_v47 }
0x14d1   :  { %v1858_v52 = vpop.eup %1857 }
0x14d2   :  { %v773_v56 = vmul.f32 %v1858_v52, %v2155_v54 }
0x1532   :  { %v991_v48 = vpop.permute.xlu0 %990 }
0x1533   :  { %v993_v49 = vmul.f32 %v1850_v5, %v991_v48 }
0x1535   :  { %v996_v51 = vpack.c.bf16 %v993_v49, %v993_v49 }
0x1536   :  { %v776_v2 = vpop.permute.xlu0 %775 }
0x1537   :  { %v778_v53 = vmul.f32 %v1858_v52, %v776_v2  ;;  %998 = vrot.lane.b32.xlu1 %v996_v51, %s1924_s16 }
0x1539   :  { %780 = vrot.lane.b32.xlu0 %v778_v53, %s1920_s23 }
0x15a9   :  { %v999_v55 = vpop.permute.xlu1 %998 }
0x15aa   :  { %1736 = vmatmul.mubr.msk.bf16.vlgmr.msra.gmra.mxu1 %vm926_vm5, %v999_v55 }
0x15ab   :  { %v781_v57 = vpop.permute.xlu0 %780  ;;  %1746 = vmatpush3.bf16.msra.mxu1 %v2183_v9  ;;  %1747 = vmatprep.mubr.msk.bf16.mxu1 %vm1918_vm1, %v1917_v1 }
0x15ac   :  { %v783_v33 = vadd.f32 %v781_v57, %v773_v56  ;;  %1757 = vmatprep.subr.bf16.mxu1 %v1917_v1 }
0x15ae   :  { %1859 = vtanh.f32 %v783_v33 }
0x15bb   :  { %v1860_v28 = vpop.eup %1859 }
0x15bc   :  { %786 = vrot.lane.b32.xlu0 %v1860_v28, %s1920_s23 }
0x15c0   :  { %551 = vrot.lane.b32.xlu0 %v2124_v17, %s1921_s3 }
0x15c4   :  { %711 = vrot.lane.b32.xlu0 %v2172_v59, %s1921_s3 }
0x162e   :  { %v787_v54 = vpop.permute.xlu0 %786 }
0x162f   :  { %v789_v22 = vmul.f32 %v1858_v52, %v787_v54  ;;  %v1143_v54 = vld [vmem:[#allocation4 + $0x18] sm:$0xff] }
0x1632   :  { %v552_v58 = vpop.permute.xlu0 %551 }
0x1633   :  { %555 = vst.msk [vmem:[#allocation3 + $0x20] sm:$0xff] %vm162_vm3, %v552_v58 }
0x1636   :  { %v712_v60 = vpop.permute.xlu0 %711 }
0x1637   :  { %715 = vst.msk [vmem:[#allocation3 + $0x30] sm:$0xff] %vm162_vm3, %v712_v60 }
0x163a   :  { %v800_v26 = vld [vmem:[#allocation3 + $0x20] sm:$0xff] }
0x166a   :  { %v1037_v63 = vpop.f32.mrf.mxu1 }
0x166b   :  { %v1043_v0 = vadd.f32 %v1037_v63, %v995_v61 }
0x166c   :  { %v1737_v7 = vpop.f32.mrf.mxu1 }
0x166d   :  { %1861 = vtanh.f32 %v1043_v0  ;;  %v1575_v17 = vmul.f32 -1.442695, %v1043_v0 }
0x166e   :  { %v1040_v62 = vpop.f32.mrf.mxu1 }
0x166f   :  { %1863 = vpow2.f32 %v1575_v17 }
0x1670   :  { %v1738_v50 = vpop.f32.mrf.mxu1 }
0x167a   :  { %v1862_v8 = vpop.eup %1861 }
0x167b   :  { %1053 = vrot.lane.b32.xlu1 %v1862_v8, %s1922_s6 }
0x167c   :  { %v1864_v59 = vpop.eup %1863 }
0x167d   :  { %v1047_v4 = vadd.f32 1.0, %v1864_v59 }
0x167f   :  { %1865 = vrcp.f32 %v1047_v4 }
0x168c   :  { %v1866_v14 = vpop.eup %1865 }
0x168d   :  { %v1051_v19 = vmul.f32 %v1866_v14, %v987_v43 }
0x16ed   :  { %v1054_v16 = vpop.permute.xlu1 %1053 }
0x16ee   :  { %v1056_v18 = vmul.f32 %v1866_v14, %v1054_v16 }
0x16f0   :  { %1058 = vrot.lane.b32.xlu1 %v1056_v18, %s1923_s1 }
0x1762   :  { %v1059_v11 = vpop.permute.xlu1 %1058 }
0x1763   :  { %v1061_v20 = vadd.f32 %v1059_v11, %v1051_v19 }
0x1765   :  { %1867 = vtanh.f32 %v1061_v20 }
0x1772   :  { %v1868_v21 = vpop.eup %1867 }
0x1773   :  { %1064 = vrot.lane.b32.xlu1 %v1868_v21, %s1923_s1 }
0x1777   :  { %631 = vrot.lane.b32.xlu1 %v2141_v37, %s1921_s3  ;;  %v802_v37 = vld [vmem:[#allocation3 + $0x30] sm:$0xff] }
0x177b   :  { %791 = vrot.lane.b32.xlu1 %v789_v22, %s1921_s3 }
0x17e5   :  { %v1065_v23 = vpop.permute.xlu1 %1064 }
0x17e6   :  { %v1067_v12 = vmul.f32 %v1866_v14, %v1065_v23 }
0x17e8   :  { %v1070_v24 = vpack.c.bf16 %v1067_v12, %v1067_v12 }
0x17e9   :  { %v632_v25 = vpop.permute.xlu1 %631 }
0x17ea   :  { %635 = vst.msk [vmem:[#allocation3 + $0x28] sm:$0xff] %vm162_vm3, %v632_v25  ;;  %1072 = vrot.lane.b32.xlu0 %v1070_v24, %s1924_s16 }
0x17ed   :  { %v792_v3 = vpop.permute.xlu1 %791 }
0x17ee   :  { %795 = vst.msk [vmem:[#allocation3 + $0x38] sm:$0xff] %vm162_vm3, %v792_v3 }
0x17f1   :  { %v801_v27 = vld [vmem:[#allocation3 + $0x28] sm:$0xff] }
0x17f2   :  { %v806_v10 = vpack.c.bf16 %v801_v27, %v800_v26 }
0x17f4   :  { %1723 = vmatprep.mubr.msk.bf16.mxu0 %vm162_vm3, %v806_v10 }
0x17f5   :  { %v803_v29 = vld [vmem:[#allocation3 + $0x38] sm:$0xff] }
0x17f6   :  { %v807_v30 = vpack.c.bf16 %v803_v29, %v802_v37 }
0x17f8   :  { %1724 = vmatmul.mubr.msk.bf16.gmra.mxu0 %vm162_vm3, %v807_v30 }
0x17f9   :  { %1741 = vmatprep.mubr.msk.bf16.mxu0 %vm1918_vm1, %v1917_v1 }
0x185c   :  { %v1073_v6 = vpop.permute.xlu0 %1072 }
0x185d   :  { %1742 = vmatmul.mubr.msk.bf16.vlgmr.msra.gmra.mxu0 %vm926_vm5, %v1073_v6 }
0x185e   :  { %1752 = vmatpush3.bf16.msra.mxu0 %v2183_v9  ;;  %1753 = vmatprep.mubr.msk.bf16.mxu0 %vm1918_vm1, %v1917_v1 }
0x185f   :  { %1763 = vmatprep.subr.bf16.mxu0 %v1917_v1 }
0x18b8   :  { %v1725_v31 = vpop.f32.mrf.mxu0 }
0x18b9   :  { %v902_v32 = vadd.f32 %v1725_v31, %v2201_v15 }
0x18ba   :  { %v893_v34 = vpop.f32.mrf.mxu0 }
0x18bb   :  { %915 = vst.msk [vmem:[#allocation4 + $0x30] sm:$0xff] %vm908_vm4, %v902_v32  ;;  %v894_v35 = vadd.f32 %v2201_v15, %v893_v34 }
0x18bc   :  { %v1726_v38 = vpop.f32.mrf.mxu0 }
0x18bd   :  { %913 = vst.msk [vmem:[#allocation4 + $0x20] sm:$0xff] %vm908_vm4, %v894_v35  ;;  %v905_v13 = vadd.f32 %v1726_v38, %v2201_v15 }
0x18be   :  { %v896_v5 = vpop.f32.mrf.mxu0 }
0x18bf   :  { %916 = vst.msk [vmem:[#allocation4 + $0x38] sm:$0xff] %vm908_vm4, %v905_v13  ;;  %v897_v39 = vadd.f32 %v2201_v15, %v896_v5 }
0x18c1   :  { %914 = vst.msk [vmem:[#allocation4 + $0x28] sm:$0xff] %vm908_vm4, %v897_v39 }
0x18c4   :  { %v1217_v23 = vld [vmem:[#allocation4 + $0x20] sm:$0xff] }
0x191d   :  { %v1111_v41 = vpop.f32.mrf.mxu0 }
0x191e   :  { %v1117_v42 = vadd.f32 %v1111_v41, %v1069_v40  ;;  %v1291_v41 = vld [vmem:[#allocation4 + $0x28] sm:$0xff] }
0x191f   :  { %v1743_v43 = vpop.f32.mrf.mxu0 }
0x1920   :  { %1869 = vtanh.f32 %v1117_v42  ;;  %v1577_v46 = vmul.f32 -1.442695, %v1117_v42 }
0x1921   :  { %v1114_v44 = vpop.f32.mrf.mxu0 }
0x1922   :  { %1871 = vpow2.f32 %v1577_v46 }
0x1923   :  { %v1744_v45 = vpop.f32.mrf.mxu0 }
0x192d   :  { %v1870_v36 = vpop.eup %1869 }
0x192e   :  { %1127 = vrot.lane.b32.xlu1 %v1870_v36, %s1922_s6 }
0x192f   :  { %v1872_v47 = vpop.eup %1871 }
0x1930   :  { %v1121_v48 = vadd.f32 1.0, %v1872_v47 }
0x1932   :  { %1873 = vrcp.f32 %v1121_v48 }
0x193f   :  { %v1874_v49 = vpop.eup %1873 }
0x1940   :  { %v1125_v52 = vmul.f32 %v1874_v49, %v1061_v20 }
0x19a0   :  { %v1128_v51 = vpop.permute.xlu1 %1127 }
0x19a1   :  { %v1130_v15 = vmul.f32 %v1874_v49, %v1128_v51 }
0x19a3   :  { %1132 = vrot.lane.b32.xlu0 %v1130_v15, %s1923_s1 }
0x1a15   :  { %v1133_v2 = vpop.permute.xlu0 %1132 }
0x1a16   :  { %v1135_v53 = vadd.f32 %v1133_v2, %v1125_v52 }
0x1a18   :  { %1875 = vtanh.f32 %v1135_v53 }
0x1a25   :  { %v1876_v55 = vpop.eup %1875 }
0x1a26   :  { %1138 = vrot.lane.b32.xlu1 %v1876_v55, %s1923_s1 }
0x1a98   :  { %v1139_v56 = vpop.permute.xlu1 %1138 }
0x1a99   :  { %v1141_v57 = vmul.f32 %v1874_v49, %v1139_v56 }
0x1a9b   :  { %v1144_v33 = vpack.c.bf16 %v1141_v57, %v1141_v57 }
0x1a9d   :  { %1146 = vrot.lane.b32.xlu0 %v1144_v33, %s1924_s16 }
0x1b0f   :  { %v1147_v28 = vpop.permute.xlu0 %1146 }
0x1b10   :  { %1748 = vmatmul.mubr.msk.bf16.vlgmr.msra.gmra.mxu1 %vm926_vm5, %v1147_v28  ;;  %v1365_v28 = vld [vmem:[#allocation4 + $0x30] sm:$0xff] }
0x1b11   :  { %1758 = vmatpush3.bf16.msra.mxu1 %v2183_v9  ;;  %1759 = vmatprep.mubr.msk.bf16.mxu1 %vm1918_vm1, %v1917_v1 }
0x1b12   :  { %1769 = vmatprep.subr.bf16.mxu1 %v1917_v1 }
0x1bd0   :  { %v1185_v58 = vpop.f32.mrf.mxu1 }
0x1bd1   :  { %v1191_v60 = vadd.f32 %v1185_v58, %v1143_v54 }
0x1bd2   :  { %v1749_v61 = vpop.f32.mrf.mxu1 }
0x1bd3   :  { %1877 = vtanh.f32 %v1191_v60  ;;  %v1579_v62 = vmul.f32 -1.442695, %v1191_v60 }
0x1bd4   :  { %v1188_v63 = vpop.f32.mrf.mxu1 }
0x1bd5   :  { %1879 = vpow2.f32 %v1579_v62 }
0x1bd6   :  { %v1750_v0 = vpop.f32.mrf.mxu1 }
0x1be0   :  { %v1878_v7 = vpop.eup %1877 }
0x1be1   :  { %1201 = vrot.lane.b32.xlu1 %v1878_v7, %s1922_s6 }
0x1be2   :  { %v1880_v50 = vpop.eup %1879 }
0x1be3   :  { %v1195_v8 = vadd.f32 1.0, %v1880_v50 }
0x1be5   :  { %1881 = vrcp.f32 %v1195_v8 }
0x1bf2   :  { %v1882_v17 = vpop.eup %1881 }
0x1bf3   :  { %v1199_v14 = vmul.f32 %v1882_v17, %v1135_v53 }
0x1c53   :  { %v1202_v59 = vpop.permute.xlu1 %1201 }
0x1c54   :  { %v1204_v4 = vmul.f32 %v1882_v17, %v1202_v59 }
0x1c56   :  { %1206 = vrot.lane.b32.xlu0 %v1204_v4, %s1923_s1 }
0x1cc8   :  { %v1207_v16 = vpop.permute.xlu0 %1206 }
0x1cc9   :  { %v1209_v18 = vadd.f32 %v1207_v16, %v1199_v14 }
0x1ccb   :  { %1883 = vtanh.f32 %v1209_v18 }
0x1cd8   :  { %v1884_v19 = vpop.eup %1883 }
0x1cd9   :  { %1212 = vrot.lane.b32.xlu1 %v1884_v19, %s1923_s1 }
0x1d4b   :  { %v1213_v11 = vpop.permute.xlu1 %1212 }
0x1d4c   :  { %v1215_v20 = vmul.f32 %v1882_v17, %v1213_v11 }
0x1d4e   :  { %v1218_v21 = vpack.c.bf16 %v1215_v20, %v1215_v20 }
0x1d50   :  { %1220 = vrot.lane.b32.xlu0 %v1218_v21, %s1924_s16 }
0x1dc2   :  { %v1221_v22 = vpop.permute.xlu0 %1220 }
0x1dc3   :  { %1754 = vmatmul.mubr.msk.bf16.vlgmr.msra.gmra.mxu0 %vm926_vm5, %v1221_v22  ;;  %v1439_v22 = vld [vmem:[#allocation4 + $0x38] sm:$0xff] }
0x1dc4   :  { %1764 = vmatpush3.bf16.msra.mxu0 %v2183_v9  ;;  %1765 = vmatprep.mubr.msk.bf16.mxu0 %vm1918_vm1, %v1917_v1 }
0x1e83   :  { %v1259_v12 = vpop.f32.mrf.mxu0 }
0x1e84   :  { %v1265_v24 = vadd.f32 %v1259_v12, %v1217_v23 }
0x1e85   :  { %v1755_v25 = vpop.f32.mrf.mxu0 }
0x1e86   :  { %1885 = vtanh.f32 %v1265_v24  ;;  %v1581_v10 = vmul.f32 -1.442695, %v1265_v24 }
0x1e87   :  { %v1262_v3 = vpop.f32.mrf.mxu0 }
0x1e88   :  { %1887 = vpow2.f32 %v1581_v10 }
0x1e89   :  { %v1756_v26 = vpop.f32.mrf.mxu0 }
0x1e93   :  { %v1886_v27 = vpop.eup %1885 }
0x1e94   :  { %1275 = vrot.lane.b32.xlu1 %v1886_v27, %s1922_s6 }
0x1e95   :  { %v1888_v37 = vpop.eup %1887 }
0x1e96   :  { %v1269_v29 = vadd.f32 1.0, %v1888_v37 }
0x1e98   :  { %1889 = vrcp.f32 %v1269_v29 }
0x1ea5   :  { %v1890_v30 = vpop.eup %1889 }
0x1ea6   :  { %v1273_v32 = vmul.f32 %v1890_v30, %v1209_v18 }
0x1f06   :  { %v1276_v6 = vpop.permute.xlu1 %1275 }
0x1f07   :  { %v1278_v31 = vmul.f32 %v1890_v30, %v1276_v6 }
0x1f09   :  { %1280 = vrot.lane.b32.xlu0 %v1278_v31, %s1923_s1  ;;  %v1588_v31 = vld [vmem:[%s2315_s7] ss:$0 sm:$0xff] }
0x1f7b   :  { %v1281_v34 = vpop.permute.xlu0 %1280 }
0x1f7c   :  { %v1283_v35 = vadd.f32 %v1281_v34, %v1273_v32 }
0x1f7e   :  { %1891 = vtanh.f32 %v1283_v35 }
0x1f8b   :  { %v1892_v38 = vpop.eup %1891 }
0x1f8c   :  { %1286 = vrot.lane.b32.xlu1 %v1892_v38, %s1923_s1 }
0x1ffe   :  { %v1287_v13 = vpop.permute.xlu1 %1286 }
0x1fff   :  { %v1289_v5 = vmul.f32 %v1890_v30, %v1287_v13  ;;  %v14_v13 = vstv %s2316_s8 }
0x2000   :  { %15 = vst [vmem:[#allocation5] sm:$0x1] %v14_v13 }
0x2001   :  { %v1292_v39 = vpack.c.bf16 %v1289_v5, %v1289_v5 }
0x2003   :  { %1294 = vrot.lane.b32.xlu0 %v1292_v39, %s1924_s16 }
0x2075   :  { %v1295_v40 = vpop.permute.xlu0 %1294 }
0x2076   :  { %1760 = vmatmul.mubr.msk.bf16.vlgmr.msra.gmra.mxu1 %vm926_vm5, %v1295_v40 }
0x2077   :  { %1770 = vmatpush3.bf16.msra.mxu1 %v2183_v9  ;;  %1771 = vmatprep.mubr.msk.bf16.mxu1 %vm1918_vm1, %v1917_v1 }
0x2136   :  { %v1333_v42 = vpop.f32.mrf.mxu1 }
0x2137   :  { %v1339_v43 = vadd.f32 %v1333_v42, %v1291_v41 }
0x2138   :  { %v1761_v44 = vpop.f32.mrf.mxu1 }
0x2139   :  { %1893 = vtanh.f32 %v1339_v43  ;;  %v1583_v47 = vmul.f32 -1.442695, %v1339_v43  ;;  %v1589_v44 = vld [vmem:[#allocation5] ss:$0 sm:$0xff] }
0x213a   :  { %v1336_v45 = vpop.f32.mrf.mxu1 }
0x213b   :  { %1895 = vpow2.f32 %v1583_v47 }
0x213c   :  { %v1762_v36 = vpop.f32.mrf.mxu1 }
0x2146   :  { %v1894_v46 = vpop.eup %1893 }
0x2147   :  { %1349 = vrot.lane.b32.xlu1 %v1894_v46, %s1922_s6 }
0x2148   :  { %v1896_v48 = vpop.eup %1895 }
0x2149   :  { %v1343_v49 = vadd.f32 1.0, %v1896_v48 }
0x214b   :  { %1897 = vrcp.f32 %v1343_v49 }
0x2158   :  { %v1898_v51 = vpop.eup %1897 }
0x2159   :  { %v1347_v1 = vmul.f32 %v1898_v51, %v1283_v35 }
0x21b9   :  { %v1350_v9 = vpop.permute.xlu1 %1349 }
0x21ba   :  { %v1352_v15 = vmul.f32 %v1898_v51, %v1350_v9 }
0x21bc   :  { %1354 = vrot.lane.b32.xlu0 %v1352_v15, %s1923_s1 }
0x222e   :  { %v1355_v52 = vpop.permute.xlu0 %1354 }
0x222f   :  { %v1357_v2 = vadd.f32 %v1355_v52, %v1347_v1 }
0x2231   :  { %1899 = vtanh.f32 %v1357_v2 }
0x223e   :  { %v1900_v53 = vpop.eup %1899 }
0x223f   :  { %1360 = vrot.lane.b32.xlu1 %v1900_v53, %s1923_s1 }
0x22b1   :  { %v1361_v55 = vpop.permute.xlu1 %1360 }
0x22b2   :  { %v1363_v56 = vmul.f32 %v1898_v51, %v1361_v55 }
0x22b4   :  { %v1366_v57 = vpack.c.bf16 %v1363_v56, %v1363_v56 }
0x22b6   :  { %1368 = vrot.lane.b32.xlu0 %v1366_v57, %s1924_s16 }
0x2328   :  { %v1369_v33 = vpop.permute.xlu0 %1368 }
0x2329   :  { %1766 = vmatmul.mubr.msk.bf16.vlgmr.msra.gmra.mxu0 %vm926_vm5, %v1369_v33 }
0x23e9   :  { %v1407_v54 = vpop.f32.mrf.mxu0 }
0x23ea   :  { %v1413_v58 = vadd.f32 %v1407_v54, %v1365_v28 }
0x23eb   :  { %v1767_v60 = vpop.f32.mrf.mxu0 }
0x23ec   :  { %1901 = vtanh.f32 %v1413_v58  ;;  %v1585_v7 = vmul.f32 -1.442695, %v1413_v58 }
0x23ed   :  { %v1410_v61 = vpop.f32.mrf.mxu0 }
0x23ee   :  { %1903 = vpow2.f32 %v1585_v7 }
0x23ef   :  { %v1768_v63 = vpop.f32.mrf.mxu0 }
0x23f9   :  { %v1902_v0 = vpop.eup %1901 }
0x23fa   :  { %1423 = vrot.lane.b32.xlu1 %v1902_v0, %s1922_s6 }
0x23fb   :  { %v1904_v62 = vpop.eup %1903 }
0x23fc   :  { %v1417_v50 = vadd.f32 1.0, %v1904_v62 }
0x23fe   :  { %1905 = vrcp.f32 %v1417_v50 }
0x240b   :  { %v1906_v8 = vpop.eup %1905 }
0x240c   :  { %v1421_v4 = vmul.f32 %v1906_v8, %v1357_v2 }
0x246c   :  { %v1424_v17 = vpop.permute.xlu1 %1423 }
0x246d   :  { %v1426_v59 = vmul.f32 %v1906_v8, %v1424_v17 }
0x246f   :  { %1428 = vrot.lane.b32.xlu0 %v1426_v59, %s1923_s1 }
0x24e1   :  { %v1429_v14 = vpop.permute.xlu0 %1428 }
0x24e2   :  { %v1431_v16 = vadd.f32 %v1429_v14, %v1421_v4 }
0x24e4   :  { %1907 = vtanh.f32 %v1431_v16 }
0x24f1   :  { %v1908_v18 = vpop.eup %1907 }
0x24f2   :  { %1434 = vrot.lane.b32.xlu1 %v1908_v18, %s1923_s1 }
0x2564   :  { %v1435_v19 = vpop.permute.xlu1 %1434 }
0x2565   :  { %v1437_v11 = vmul.f32 %v1906_v8, %v1435_v19 }
0x2567   :  { %v1440_v20 = vpack.c.bf16 %v1437_v11, %v1437_v11 }
0x2569   :  { %1442 = vrot.lane.b32.xlu0 %v1440_v20, %s1924_s16 }
0x25db   :  { %v1443_v21 = vpop.permute.xlu0 %1442 }
0x25dc   :  { %1772 = vmatmul.mubr.msk.bf16.vlgmr.msra.gmra.mxu1 %vm926_vm5, %v1443_v21 }
0x269c   :  { %v1481_v23 = vpop.f32.mrf.mxu1 }
0x269d   :  { %v1487_v12 = vadd.f32 %v1481_v23, %v1439_v22 }
0x269e   :  { %v1773_v24 = vpop.f32.mrf.mxu1 }
0x269f   :  { %1909 = vtanh.f32 %v1487_v12  ;;  %v1587_v27 = vmul.f32 -1.442695, %v1487_v12 }
0x26a0   :  { %v1484_v25 = vpop.f32.mrf.mxu1 }
0x26a1   :  { %1911 = vpow2.f32 %v1587_v27 }
0x26a2   :  { %v1774_v3 = vpop.f32.mrf.mxu1 }
0x26ac   :  { %v1910_v26 = vpop.eup %1909 }
0x26ad   :  { %1497 = vrot.lane.b32.xlu1 %v1910_v26, %s1922_s6 }
0x26ae   :  { %v1912_v10 = vpop.eup %1911 }
0x26af   :  { %v1491_v37 = vadd.f32 1.0, %v1912_v10 }
0x26b1   :  { %1913 = vrcp.f32 %v1491_v37 }
0x26be   :  { %v1914_v29 = vpop.eup %1913 }
0x26bf   :  { %v1495_v32 = vmul.f32 %v1914_v29, %v1431_v16 }
0x271f   :  { %v1498_v30 = vpop.permute.xlu1 %1497 }
0x2720   :  { %v1500_v6 = vmul.f32 %v1914_v29, %v1498_v30 }
0x2722   :  { %1502 = vrot.lane.b32.xlu0 %v1500_v6, %s1923_s1 }
0x2726   :  { %1518 = vrot.lane.b32.xlu0 %v1588_v31, %s1920_s23 }
0x2794   :  { %v1503_v34 = vpop.permute.xlu0 %1502 }
0x2795   :  { %v1505_v35 = vadd.f32 %v1503_v34, %v1495_v32 }
0x2797   :  { %1915 = vtanh.f32 %v1505_v35 }
0x2798   :  { %v1519_v39 = vpop.permute.xlu0 %1518 }
0x27a4   :  { %v1916_v38 = vpop.eup %1915 }
0x27a5   :  { %1508 = vrot.lane.b32.xlu1 %v1916_v38, %s1923_s1 }
0x2817   :  { %v1509_v5 = vpop.permute.xlu1 %1508 }
0x2818   :  { %v1511_v40 = vmul.f32 %v1914_v29, %v1509_v5 }
0x281a   :  { %v1521_v41 = vmul.f32 %v1519_v39, %v1511_v40 }
0x281c   :  { %1523 = vrot.lane.b32.xlu1 %v1521_v41, %s1924_s16 }
0x288e   :  { %v1524_v42 = vpop.permute.xlu1 %1523 }
0x288f   :  { %v1526_v43 = vsel %vm926_vm5, %v1524_v42, 0.0 }
0x2890   :  { %1527 = vadd.xlane.f32.xlu0 %v1526_v43 }
0x2919   :  { %v1528_v45 = vpop.xlane.xlu0 %1527 }
0x291a   :  { %v1536_v36 = vadd.f32 %v1589_v44, %v1528_v45 }
0x291c   :  { %1538 = vst.msk [vmem:[%s2317_s9] sm:$0xff] %vm1537_vm6, %v1536_v36 }

</bundles_post_ra>
